<compile_context>
chip_gen: v7x
topology: tpu7x:2x2x1
jax: 0.10.0
libtpu: 0.0.40
codegen_flags: <defaults>
</compile_context>

<pallas_src>
import math

import numpy as np
import jax
import jax.numpy as jnp
from jax import lax
from jax.experimental import pallas as pl
from jax.experimental.pallas import tpu as pltpu


TM_MAX = 256   # max rows (priors) per grid step; multiple of 8 (f32) / 16 (bf16)
TM_MIN = 32    # floor for tiny tail groups
LANE = 128     # TPU lane width; fused Cout is padded to a multiple of this


# ----------------------------- Pallas kernel -----------------------------

def _fused_head_kernel(sidx_ref, p_ref, w_ref, b_ref, o_ref):
    # sidx_ref: (n_tiles,) int32 in SMEM (scalar prefetch; used by index_maps)
    # p_ref:    (TM, K)          bf16 im2col patches for this row tile
    # w_ref:    (K, COUT_PAD)    bf16 fused (loc | cls) weights of the scale
    # b_ref:    (1, COUT_PAD)    f32 fused bias
    # o_ref:    (TM, COUT_PAD)   f32 fused outputs, lane-dense (128-multiple)
    del sidx_ref
    acc = jnp.dot(p_ref[...], w_ref[...], preferred_element_type=jnp.float32)
    o_ref[...] = acc + b_ref[...]


def fused_prediction_matmul(sidx, patches, w_stack, b_stack, *, tm):
    """Grouped, scale-indexed matmul over one Cin-group.

    patches: (M_total, K) bf16, rows grouped per scale and padded to `tm`.
    w_stack: (n_scales, K, COUT_PAD) bf16; b_stack: (n_scales, 1, COUT_PAD) f32.
    sidx:    (M_total // tm,) int32 — scale index of each row tile.
    """
    m_total, k = patches.shape
    cout_pad = w_stack.shape[-1]
    n_tiles = m_total // tm

    flops = 2 * m_total * k * cout_pad
    bytes_accessed = (patches.size * patches.dtype.itemsize
                      + w_stack.size * w_stack.dtype.itemsize
                      + b_stack.size * b_stack.dtype.itemsize
                      + m_total * cout_pad * 4)

    return pl.pallas_call(
        _fused_head_kernel,
        out_shape=jax.ShapeDtypeStruct((m_total, cout_pad), jnp.float32),
        grid_spec=pltpu.PrefetchScalarGridSpec(
            num_scalar_prefetch=1,
            grid=(n_tiles,),
            in_specs=[
                pl.BlockSpec((tm, k), lambda i, s: (i, 0)),
                # Weight / bias blocks are indexed only by the scale of the
                # current tile -> unchanged block index across consecutive
                # same-scale tiles, so they stay VMEM-resident (no re-DMA).
                # TODO(synk): on v7x, single-buffer this spec
                # (pipeline_mode=pl.Buffered(1)) to reclaim ~4.5 MiB at real
                # SSD channels and keep TM=512 double-buffered.
                pl.BlockSpec((None, k, cout_pad), lambda i, s: (s[i], 0, 0)),
                pl.BlockSpec((None, 1, cout_pad), lambda i, s: (s[i], 0, 0)),
            ],
            out_specs=pl.BlockSpec((tm, cout_pad), lambda i, s: (i, 0)),
        ),
        compiler_params=pltpu.CompilerParams(
            dimension_semantics=("parallel",),
            # Safe on all generations; raise (v5e/v6e) when sweeping TM at
            # real SSD channels, keep <= ~48 MiB on v7x (64 MiB physical).
            vmem_limit_bytes=32 * 1024 * 1024,
        ),
        cost_estimate=pl.CostEstimate(flops=flops, transcendentals=0,
                                      bytes_accessed=bytes_accessed),
    )(sidx, patches, w_stack, b_stack)


# ----------------------------- wrapper glue -------------------------------

def _im2col_3x3_same(x_nhwc):
    """3x3 SAME im2col.  Returns (N*H*W, 9*C); last axis ordered (kh, kw, c),
    matching w_hwio.reshape(9*C, Cout)."""
    N, H, W, C = x_nhwc.shape
    xp = jnp.pad(x_nhwc, ((0, 0), (1, 1), (1, 1), (0, 0)))
    cols = [xp[:, kh:kh + H, kw:kw + W, :]
            for kh in range(3) for kw in range(3)]
    return jnp.concatenate(cols, axis=-1).reshape(N * H * W, 9 * C)


def _xavier_uniform(key, cin, cout):
    """nn.init.xavier_uniform_ on a 3x3 conv weight, generated as HWIO."""
    fan_in = cin * 9
    fan_out = cout * 9
    bound = math.sqrt(6.0 / (fan_in + fan_out))
    return jax.random.uniform(key, (3, 3, cin, cout), jnp.float32, -bound, bound)


def _pick_tm(max_rows):
    """Per-group row tile: shrink TM for groups whose biggest scale is tiny,
    so tail scales don't pay for nearly-empty full-size tiles."""
    tm = TM_MAX
    while tm > TM_MIN and max_rows <= tm // 2:
        tm //= 2
    return tm


class PredictionConvolutionsPallas:
    """JAX/Pallas port of SSD PredictionConvolutions (forward pass)."""

    N_BOXES = {'conv4_3': 4, 'conv7': 6, 'conv8_2': 6, 'conv9_2': 6,
               'conv10_2': 4, 'conv11_2': 4}
    # Scaled-down in-channels (orig: 512, 1024, 512, 256, 256, 256)
    IN_CH = {'conv4_3': 32, 'conv7': 64, 'conv8_2': 32, 'conv9_2': 16,
             'conv10_2': 16, 'conv11_2': 16}
    ORDER = ['conv4_3', 'conv7', 'conv8_2', 'conv9_2', 'conv10_2', 'conv11_2']

    def __init__(self, n_classes, key):
        self.n_classes = n_classes
        self.params = {}
        self.head_dims = {}
        for i, name in enumerate(self.ORDER):
            cin = self.IN_CH[name]
            loc_out = self.N_BOXES[name] * 4
            # Reproduce the original module exactly: cl_conv4_3 uses
            # n_boxes['conv11_2'] (== 4) rather than n_boxes['conv4_3'].
            nb_cls = (self.N_BOXES['conv11_2'] if name == 'conv4_3'
                      else self.N_BOXES[name])
            cls_out = nb_cls * n_classes
            k_loc, k_cls = jax.random.split(jax.random.fold_in(key, i))
            self.params['loc_' + name] = (
                _xavier_uniform(k_loc, cin, loc_out),
                jnp.zeros((loc_out,), jnp.float32))
            self.params['cl_' + name] = (
                _xavier_uniform(k_cls, cin, cls_out),
                jnp.zeros((cls_out,), jnp.float32))
            self.head_dims[name] = (loc_out, cls_out)

        # Group scales by in-channel count: every scale in a group shares the
        # same im2col width K = 9*Cin, so no K padding is needed anywhere.
        by_cin = {}
        for name in self.ORDER:
            by_cin.setdefault(self.IN_CH[name], []).append(name)

        self.groups = []
        for cin, names in by_cin.items():
            k = 9 * cin
            fused_max = max(sum(self.head_dims[n]) for n in names)
            cout_pad = -(-fused_max // LANE) * LANE   # lane-dense output
            w_list, b_list = [], []
            for n in names:
                wl, bl = self.params['loc_' + n]
                wc, bc = self.params['cl_' + n]
                w = jnp.concatenate([wl.reshape(k, -1), wc.reshape(k, -1)],
                                    axis=1)
                b = jnp.concatenate([bl, bc])
                w = jnp.pad(w, ((0, 0), (0, cout_pad - w.shape[1])))
                b = jnp.pad(b, (0, cout_pad - b.shape[0]))
                w_list.append(w.astype(jnp.bfloat16))
                b_list.append(b.astype(jnp.float32))
            self.groups.append(dict(
                names=names, k=k, cout_pad=cout_pad,
                w_stack=jnp.stack(w_list),               # (ns, K, COUT_PAD) bf16
                b_stack=jnp.stack(b_list)[:, None, :],   # (ns, 1, COUT_PAD) f32
            ))

    def __call__(self, *feats_nchw):
        """feats_nchw: six NCHW feature maps (PyTorch convention)."""
        assert len(feats_nchw) == len(self.ORDER)
        feats = dict(zip(self.ORDER, feats_nchw))
        batch = feats_nchw[0].shape[0]

        per_scale = {}
        for g in self.groups:
            rows_per_scale = [feats[n].shape[0] * feats[n].shape[2] *
                              feats[n].shape[3] for n in g['names']]
            tm = _pick_tm(max(rows_per_scale))

            patch_chunks, sidx_chunks, meta = [], [], []
            for s_i, name in enumerate(g['names']):
                x = feats[name]
                N, C, H, W = x.shape
                # TODO(synk): move this im2col into the kernel (halo'd input
                # tile + 9 shifted matmuls) to avoid the 9x HBM expansion.
                x_nhwc = jnp.transpose(x, (0, 2, 3, 1)).astype(jnp.bfloat16)
                p = _im2col_3x3_same(x_nhwc)              # (N*H*W, 9*C) bf16
                rows = N * H * W
                rows_pad = -(-rows // tm) * tm            # per-scale tm padding
                p = jnp.pad(p, ((0, rows_pad - rows), (0, 0)))
                patch_chunks.append(p)
                sidx_chunks.append(np.full((rows_pad // tm,), s_i, np.int32))
                meta.append((name, rows, rows_pad))

            patches = jnp.concatenate(patch_chunks, axis=0)   # (M_total, K)
            sidx = jnp.asarray(np.concatenate(sidx_chunks))   # (n_tiles,) i32

            out = fused_prediction_matmul(sidx, patches,
                                          g['w_stack'], g['b_stack'], tm=tm)

            off = 0
            for name, rows, rows_pad in meta:
                loc_out, cls_out = self.head_dims[name]
                seg = out[off: off + rows]                    # drop row padding
                off += rows_pad
                # NHWC-flattened rows => PyTorch permute(0,2,3,1).view(...)
                # is a plain reshape here.
                per_scale[name] = (
                    seg[:, :loc_out].reshape(batch, -1, 4),
                    seg[:, loc_out: loc_out + cls_out]
                    .reshape(batch, -1, self.n_classes))

        locs = jnp.concatenate([per_scale[n][0] for n in self.ORDER], axis=1)
        scores = jnp.concatenate([per_scale[n][1] for n in self.ORDER], axis=1)
        return locs, scores


# ----------------------------- pure-JAX ref -------------------------------

def _ref_conv3x3(x_nhwc, w_hwio, b):
    y = lax.conv_general_dilated(
        x_nhwc, w_hwio, window_strides=(1, 1), padding='SAME',
        dimension_numbers=('NHWC', 'HWIO', 'NHWC'))
    return y + b


def _ref_forward(model, *feats_nchw):
    batch = feats_nchw[0].shape[0]
    locs, scores = [], []
    for name, x in zip(model.ORDER, feats_nchw):
        x_nhwc = jnp.transpose(x, (0, 2, 3, 1))
        wl, bl = model.params['loc_' + name]
        wc, bc = model.params['cl_' + name]
        locs.append(_ref_conv3x3(x_nhwc, wl, bl).reshape(batch, -1, 4))
        scores.append(_ref_conv3x3(x_nhwc, wc, bc).reshape(batch, -1,
                                                           model.n_classes))
    return jnp.concatenate(locs, axis=1), jnp.concatenate(scores, axis=1)


# --------------------------------- main -----------------------------------

if __name__ == "__main__":
    n_classes = 4
    batch = 2
    key = jax.random.PRNGKey(0)
    k_param, k_data = jax.random.split(key)

    model = PredictionConvolutionsPallas(n_classes, k_param)

    # Feature-map spatial sizes match SSD (total priors == 8732); channels
    # are scaled down (see IN_CH above).  Inputs are NCHW like PyTorch.
    shapes = {
        'conv4_3':  (batch, 32, 38, 38),
        'conv7':    (batch, 64, 19, 19),
        'conv8_2':  (batch, 32, 10, 10),
        'conv9_2':  (batch, 16, 5, 5),
        'conv10_2': (batch, 16, 3, 3),
        'conv11_2': (batch, 16, 1, 1),
    }
    feats = []
    for i, name in enumerate(model.ORDER):
        feats.append(jax.random.normal(jax.random.fold_in(k_data, i),
                                       shapes[name], jnp.float32))

    forward = jax.jit(model.__call__)
    locs, class_scores = forward(*feats)
    locs = jax.block_until_ready(locs)
    class_scores = jax.block_until_ready(class_scores)

    # shape checks (8732 priors, like the original SSD head)
    assert locs.shape == (batch, 8732, 4), locs.shape
    assert class_scores.shape == (batch, 8732, n_classes), class_scores.shape

    # numerical check vs pure-JAX f32 reference conv.  Kernel runs the matmul
    # in bf16 (f32 accumulate), so tolerance is loosened accordingly.  Keep
    # patches in f32 if tighter parity with the PyTorch f32 conv is required.
    ref_locs, ref_scores = _ref_forward(model, *feats)
    assert jnp.allclose(locs, ref_locs, rtol=5e-2, atol=5e-2)
    assert jnp.allclose(class_scores, ref_scores, rtol=5e-2, atol=5e-2)

    print("KERNEL_OK")
</pallas_src>

<mosaic_0001>
module attributes {stable_mosaic.version = 11 : i64} {
  func.func @_fused_head_kernel(%arg0: i32, %arg1: memref<13xi32, #tpu.memory_space<smem>>, %arg2: memref<256x288xbf16, #tpu.memory_space<vmem>>, %arg3: memref<1x288x128xbf16, #tpu.memory_space<vmem>>, %arg4: memref<1x1x128xf32, #tpu.memory_space<vmem>>, %arg5: memref<256x128xf32, #tpu.memory_space<vmem>>) attributes {dimension_semantics = [#tpu.dimension_semantics<parallel>], iteration_bounds = array<i64: 13>, scalar_prefetch = 1 : i64, scratch_operands = 0 : i64, tpu.core_type = #tpu.core_type<tc>, window_params = [{transform_indices = @transform_0, window_bounds = array<i64: 256, 288>}, {transform_indices = @transform_1, window_bounds = array<i64: 1, 288, 128>}, {transform_indices = @transform_2, window_bounds = array<i64: 1, 1, 128>}, {transform_indices = @transform_3, window_bounds = array<i64: 256, 128>}]} {
    %c0 = arith.constant 0 : index
    %c0_0 = arith.constant 0 : index
    %0 = vector.load %arg2[%c0, %c0_0] : memref<256x288xbf16, #tpu.memory_space<vmem>>, vector<256x288xbf16>
    %c0_1 = arith.constant 0 : index
    %c0_2 = arith.constant 0 : index
    %c0_3 = arith.constant 0 : index
    %1 = vector.load %arg3[%c0_1, %c0_2, %c0_3] : memref<1x288x128xbf16, #tpu.memory_space<vmem>>, vector<1x288x128xbf16>
    %2 = vector.shape_cast %1 : vector<1x288x128xbf16> to vector<288x128xbf16>
    %cst = arith.constant dense<0.000000e+00> : vector<256x128xf32>
    %3 = tpu.matmul %0, %2, %cst {dimension_numbers = #tpu.dot_dimension_numbers<[1], [0], [0], [1], [0, 0, 1, 1], [], []>} : vector<256x288xbf16>, vector<288x128xbf16>, vector<256x128xf32> -> vector<256x128xf32>
    %c0_4 = arith.constant 0 : index
    %c0_5 = arith.constant 0 : index
    %c0_6 = arith.constant 0 : index
    %4 = vector.load %arg4[%c0_4, %c0_5, %c0_6] : memref<1x1x128xf32, #tpu.memory_space<vmem>>, vector<1x1x128xf32>
    %5 = vector.shape_cast %4 : vector<1x1x128xf32> to vector<1x128xf32>
    %6 = vector.broadcast %5 : vector<1x128xf32> to vector<256x128xf32>
    %7 = arith.addf %3, %6 : vector<256x128xf32>
    %c0_7 = arith.constant 0 : index
    %c0_8 = arith.constant 0 : index
    %8 = vector.load %arg5[%c0_7, %c0_8] : memref<256x128xf32, #tpu.memory_space<vmem>>, vector<256x128xf32>
    tpu.vector_store %arg5[%c0_7, %c0_8], %7 {strides = array<i32>} : memref<256x128xf32, #tpu.memory_space<vmem>>, vector<256x128xf32>,
    return
  }
  func.func @transform_0(%arg0: i32, %arg1: memref<13xi32, #tpu.memory_space<smem>>) -> (i32, i32) {
    %c0_i32 = arith.constant 0 : i32
    %c0_i32_0 = arith.constant 0 : i32
    return %arg0, %c0_i32 : i32, i32
  }
  func.func @transform_1(%arg0: i32, %arg1: memref<13xi32, #tpu.memory_space<smem>>) -> (i32, i32, i32) {
    %0 = arith.index_cast %arg0 : i32 to index
    %1 = memref.load %arg1[%0] : memref<13xi32, #tpu.memory_space<smem>>
    %c0_i32 = arith.constant 0 : i32
    %c0_i32_0 = arith.constant 0 : i32
    %c0_i32_1 = arith.constant 0 : i32
    return %1, %c0_i32, %c0_i32_0 : i32, i32, i32
  }
  func.func @transform_2(%arg0: i32, %arg1: memref<13xi32, #tpu.memory_space<smem>>) -> (i32, i32, i32) {
    %0 = arith.index_cast %arg0 : i32 to index
    %1 = memref.load %arg1[%0] : memref<13xi32, #tpu.memory_space<smem>>
    %c0_i32 = arith.constant 0 : i32
    %c0_i32_0 = arith.constant 0 : i32
    %c0_i32_1 = arith.constant 0 : i32
    return %1, %c0_i32, %c0_i32_0 : i32, i32, i32
  }
  func.func @transform_3(%arg0: i32, %arg1: memref<13xi32, #tpu.memory_space<smem>>) -> (i32, i32) {
    %c0_i32 = arith.constant 0 : i32
    %c0_i32_0 = arith.constant 0 : i32
    return %arg0, %c0_i32 : i32, i32
  }
}

module attributes {stable_mosaic.version = 11 : i64} {
  func.func @_fused_head_kernel(%arg0: i32, %arg1: memref<3xi32, #tpu.memory_space<smem>>, %arg2: memref<256x576xbf16, #tpu.memory_space<vmem>>, %arg3: memref<1x576x128xbf16, #tpu.memory_space<vmem>>, %arg4: memref<1x1x128xf32, #tpu.memory_space<vmem>>, %arg5: memref<256x128xf32, #tpu.memory_space<vmem>>) attributes {dimension_semantics = [#tpu.dimension_semantics<parallel>], iteration_bounds = array<i64: 3>, scalar_prefetch = 1 : i64, scratch_operands = 0 : i64, tpu.core_type = #tpu.core_type<tc>, window_params = [{transform_indices = @transform_0, window_bounds = array<i64: 256, 576>}, {transform_indices = @transform_1, window_bounds = array<i64: 1, 576, 128>}, {transform_indices = @transform_2, window_bounds = array<i64: 1, 1, 128>}, {transform_indices = @transform_3, window_bounds = array<i64: 256, 128>}]} {
    %c0 = arith.constant 0 : index
    %c0_0 = arith.constant 0 : index
    %0 = vector.load %arg2[%c0, %c0_0] : memref<256x576xbf16, #tpu.memory_space<vmem>>, vector<256x576xbf16>
    %c0_1 = arith.constant 0 : index
    %c0_2 = arith.constant 0 : index
    %c0_3 = arith.constant 0 : index
    %1 = vector.load %arg3[%c0_1, %c0_2, %c0_3] : memref<1x576x128xbf16, #tpu.memory_space<vmem>>, vector<1x576x128xbf16>
    %2 = vector.shape_cast %1 : vector<1x576x128xbf16> to vector<576x128xbf16>
    %cst = arith.constant dense<0.000000e+00> : vector<256x128xf32>
    %3 = tpu.matmul %0, %2, %cst {dimension_numbers = #tpu.dot_dimension_numbers<[1], [0], [0], [1], [0, 0, 1, 1], [], []>} : vector<256x576xbf16>, vector<576x128xbf16>, vector<256x128xf32> -> vector<256x128xf32>
    %c0_4 = arith.constant 0 : index
    %c0_5 = arith.constant 0 : index
    %c0_6 = arith.constant 0 : index
    %4 = vector.load %arg4[%c0_4, %c0_5, %c0_6] : memref<1x1x128xf32, #tpu.memory_space<vmem>>, vector<1x1x128xf32>
    %5 = vector.shape_cast %4 : vector<1x1x128xf32> to vector<1x128xf32>
    %6 = vector.broadcast %5 : vector<1x128xf32> to vector<256x128xf32>
    %7 = arith.addf %3, %6 : vector<256x128xf32>
    %c0_7 = arith.constant 0 : index
    %c0_8 = arith.constant 0 : index
    %8 = vector.load %arg5[%c0_7, %c0_8] : memref<256x128xf32, #tpu.memory_space<vmem>>, vector<256x128xf32>
    tpu.vector_store %arg5[%c0_7, %c0_8], %7 {strides = array<i32>} : memref<256x128xf32, #tpu.memory_space<vmem>>, vector<256x128xf32>,
    return
  }
  func.func @transform_0(%arg0: i32, %arg1: memref<3xi32, #tpu.memory_space<smem>>) -> (i32, i32) {
    %c0_i32 = arith.constant 0 : i32
    %c0_i32_0 = arith.constant 0 : i32
    return %arg0, %c0_i32 : i32, i32
  }
  func.func @transform_1(%arg0: i32, %arg1: memref<3xi32, #tpu.memory_space<smem>>) -> (i32, i32, i32) {
    %0 = arith.index_cast %arg0 : i32 to index
    %1 = memref.load %arg1[%0] : memref<3xi32, #tpu.memory_space<smem>>
    %c0_i32 = arith.constant 0 : i32
    %c0_i32_0 = arith.constant 0 : i32
    %c0_i32_1 = arith.constant 0 : i32
    return %1, %c0_i32, %c0_i32_0 : i32, i32, i32
  }
  func.func @transform_2(%arg0: i32, %arg1: memref<3xi32, #tpu.memory_space<smem>>) -> (i32, i32, i32) {
    %0 = arith.index_cast %arg0 : i32 to index
    %1 = memref.load %arg1[%0] : memref<3xi32, #tpu.memory_space<smem>>
    %c0_i32 = arith.constant 0 : i32
    %c0_i32_0 = arith.constant 0 : i32
    %c0_i32_1 = arith.constant 0 : i32
    return %1, %c0_i32, %c0_i32_0 : i32, i32, i32
  }
  func.func @transform_3(%arg0: i32, %arg1: memref<3xi32, #tpu.memory_space<smem>>) -> (i32, i32) {
    %c0_i32 = arith.constant 0 : i32
    %c0_i32_0 = arith.constant 0 : i32
    return %arg0, %c0_i32 : i32, i32
  }
}

module attributes {stable_mosaic.version = 11 : i64} {
  func.func @_fused_head_kernel(%arg0: i32, %arg1: memref<3xi32, #tpu.memory_space<smem>>, %arg2: memref<64x144xbf16, #tpu.memory_space<vmem>>, %arg3: memref<1x144x128xbf16, #tpu.memory_space<vmem>>, %arg4: memref<1x1x128xf32, #tpu.memory_space<vmem>>, %arg5: memref<64x128xf32, #tpu.memory_space<vmem>>) attributes {dimension_semantics = [#tpu.dimension_semantics<parallel>], iteration_bounds = array<i64: 3>, scalar_prefetch = 1 : i64, scratch_operands = 0 : i64, tpu.core_type = #tpu.core_type<tc>, window_params = [{transform_indices = @transform_0, window_bounds = array<i64: 64, 144>}, {transform_indices = @transform_1, window_bounds = array<i64: 1, 144, 128>}, {transform_indices = @transform_2, window_bounds = array<i64: 1, 1, 128>}, {transform_indices = @transform_3, window_bounds = array<i64: 64, 128>}]} {
    %c0 = arith.constant 0 : index
    %c0_0 = arith.constant 0 : index
    %0 = vector.load %arg2[%c0, %c0_0] : memref<64x144xbf16, #tpu.memory_space<vmem>>, vector<64x144xbf16>
    %c0_1 = arith.constant 0 : index
    %c0_2 = arith.constant 0 : index
    %c0_3 = arith.constant 0 : index
    %1 = vector.load %arg3[%c0_1, %c0_2, %c0_3] : memref<1x144x128xbf16, #tpu.memory_space<vmem>>, vector<1x144x128xbf16>
    %2 = vector.shape_cast %1 : vector<1x144x128xbf16> to vector<144x128xbf16>
    %cst = arith.constant dense<0.000000e+00> : vector<64x128xf32>
    %3 = tpu.matmul %0, %2, %cst {dimension_numbers = #tpu.dot_dimension_numbers<[1], [0], [0], [1], [0, 0, 1, 1], [], []>} : vector<64x144xbf16>, vector<144x128xbf16>, vector<64x128xf32> -> vector<64x128xf32>
    %c0_4 = arith.constant 0 : index
    %c0_5 = arith.constant 0 : index
    %c0_6 = arith.constant 0 : index
    %4 = vector.load %arg4[%c0_4, %c0_5, %c0_6] : memref<1x1x128xf32, #tpu.memory_space<vmem>>, vector<1x1x128xf32>
    %5 = vector.shape_cast %4 : vector<1x1x128xf32> to vector<1x128xf32>
    %6 = vector.broadcast %5 : vector<1x128xf32> to vector<64x128xf32>
    %7 = arith.addf %3, %6 : vector<64x128xf32>
    %c0_7 = arith.constant 0 : index
    %c0_8 = arith.constant 0 : index
    %8 = vector.load %arg5[%c0_7, %c0_8] : memref<64x128xf32, #tpu.memory_space<vmem>>, vector<64x128xf32>
    tpu.vector_store %arg5[%c0_7, %c0_8], %7 {strides = array<i32>} : memref<64x128xf32, #tpu.memory_space<vmem>>, vector<64x128xf32>,
    return
  }
  func.func @transform_0(%arg0: i32, %arg1: memref<3xi32, #tpu.memory_space<smem>>) -> (i32, i32) {
    %c0_i32 = arith.constant 0 : i32
    %c0_i32_0 = arith.constant 0 : i32
    return %arg0, %c0_i32 : i32, i32
  }
  func.func @transform_1(%arg0: i32, %arg1: memref<3xi32, #tpu.memory_space<smem>>) -> (i32, i32, i32) {
    %0 = arith.index_cast %arg0 : i32 to index
    %1 = memref.load %arg1[%0] : memref<3xi32, #tpu.memory_space<smem>>
    %c0_i32 = arith.constant 0 : i32
    %c0_i32_0 = arith.constant 0 : i32
    %c0_i32_1 = arith.constant 0 : i32
    return %1, %c0_i32, %c0_i32_0 : i32, i32, i32
  }
  func.func @transform_2(%arg0: i32, %arg1: memref<3xi32, #tpu.memory_space<smem>>) -> (i32, i32, i32) {
    %0 = arith.index_cast %arg0 : i32 to index
    %1 = memref.load %arg1[%0] : memref<3xi32, #tpu.memory_space<smem>>
    %c0_i32 = arith.constant 0 : i32
    %c0_i32_0 = arith.constant 0 : i32
    %c0_i32_1 = arith.constant 0 : i32
    return %1, %c0_i32, %c0_i32_0 : i32, i32, i32
  }
  func.func @transform_3(%arg0: i32, %arg1: memref<3xi32, #tpu.memory_space<smem>>) -> (i32, i32) {
    %c0_i32 = arith.constant 0 : i32
    %c0_i32_0 = arith.constant 0 : i32
    return %arg0, %c0_i32 : i32, i32
  }
}

</mosaic_0001>

<bundles_post_ra>
// kernel: a_call__.3
= control target key start
LH: loop header
LB: loop body
LE: loop exit
PB: predicated region body
PF: predicated region fallthrough
CT: control target
= control target key end

     0   :  { %s1805_s0 = inlined_call_operand.vmem [shape: s32[13], index: 0, kind: input, shape index: {}]   ;;  %s1806_s1 = inlined_call_operand.vmem [shape: bf16[3328,288], index: 1, kind: input, shape index: {}]   ;;  %s1807_s2 = inlined_call_operand.vmem [shape: bf16[2,288,128], index: 2, kind: input, shape index: {}]   ;;  %s1808_s3 = inlined_call_operand.vmem [shape: f32[2,1,128], index: 3, kind: input, shape index: {}]   ;;  %s1809_s4 = inlined_call_operand.vmem [shape: f32[3328,128], index: 4, kind: output, shape index: {}]  }
   0x1   :  { %s9_s17 = sshll.u32 %s1805_s0, 4  ;;  %s10_s17 = int_to_ptr.vmem [resolvable:$true] %s9_s17 }
   0x2   :  { %s1538_s18 = scalar_lea.vmem %s10_s17, 16  ;;  %p1543_p1 = scmp.lt.s32.totalorder %s10_s17, %s10_s17 }
   0x3   :  { %p1539_p0 = scmp.ne.s32.totalorder %s10_s17, %s1538_s18  ;;  %p1544_p2 = scmp.lt.s32.totalorder %s1538_s18, %s1538_s18 }
   0x5   :  { %p1545_p3 = por %p1544_p2, %p1543_p1 }
   0x7   :  { %p1546_p4 = pnand %p1545_p3, %p1539_p0 }
   0x9   :  { %1549 = shalt.err (!%p1546_p4)  }
   0xa   :  { %s1560_s19 = smov [#allocation3]  }
   0xb   :  { %12 = dma.vmem_to_smem %s10_s17, 16, %s1560_s19, [#allocation2] }
   0xc   :  { %1554 = dma.done.wait [#allocation2], 16 }
   0xd   :  { %1555 = vsyncadd [#allocation2], 4294967280 }
   0xe   :  { %14 = sfence }
   0xf   :  { %s1589_s20 = smov 0  }
  0x10 LB: > { %s1595_s0 = sadd.s32 4294967295, %s1558_s20   ;;  %p1172_p5 = scmp.ge.s32.totalorder %s1558_s20, 1  ;;  %s1558_s20 = sphi %s1589_s20, %s20_s20  }
  0x11   : > { %p172_p6 = scmp.lt.s32.totalorder %s1558_s20, 14 }
  0x13   : > { %p173_p7 = pnand %p1172_p5, %p172_p6 }
  0x14   : > { %s214_s21 = sld [smem:[#allocation3 + %s1595_s0]] (!%p173_p7)  ;;  %s1173_s22 = sshll.u32 (!%p173_p7), %s1595_s0, 5  ;;  %vm688_vm0 = vcmask (!%p173_p7), 261120  }
  0x15   : > { %176 = sbr.rel (%p173_p7) target bundleno = 377 (0x179), region = 32  ;;  %p208_p8 = scmp.lt.s32.totalorder (!%p173_p7), %s1173_s22, 415 }
  0x16   : > { %s221_s5 = sld [smem:[#allocation3 + %s1595_s0]] (!%p173_p7) }
  0x1a   : > { %p215_p9 = scmp.lt.s32.totalorder (!%p173_p7), %s214_s21, 1 }
  0x1c   : > { %s1811_s22 = smov (!%p208_p8, %s1173_s22), 415  ;;  %s1813_s21 = smov (!%p215_p9, %s214_s21), 1 }
  0x1d   : > { %s1445_s23 = smul.u32 12, %s1811_s22  ;;  %p222_p10 = scmp.lt.s32.totalorder %s221_s5, 1 }
  0x1e   : > { %s1446_s27 = smul.u32 144, %s1813_s21  ;;  %s1177_s9 = sshll.u32 %s1811_s22, 3 }
  0x1f   : > { %s1607_s26 = scalar_lea.vmem %s1806_s1, %s1445_s23  ;;  %s1815_s5 = smov (!%p222_p10, %s221_s5), 1 }
  0x20   : > { %v1474_v0 = vld [vmem:[%s1607_s26 + $0x4] ss:$12 sps:$4 sm:$0xff]   ;;  %s1614_s30 = scalar_lea.vmem %s1807_s2, %s1446_s27  ;;  %v1472_v19 = vld [vmem:[%s1607_s26] ss:$12 sps:$4 sm:$0xff]   ;;  %v1479_v21 = vld [vmem:[%s1607_s26 + $0x1c] ss:$12 sps:$4 sm:$0xff]   ;;  %s224_s8 = scalar_lea.vmem %s1808_s3, %s1815_s5 }
  0x21   : > { %v1477_v1 = vld [vmem:[%s1607_s26 + $0x124] ss:$12 sps:$4 sm:$0xff]   ;;  %769 = vmatprep.mubr.bf16.mxu0 %v1474_v0  ;;  %v1458_v4 = vld [vmem:[%s1614_s30 + $0x48] sm:$0xff]   ;;  %v1462_v8 = vld [vmem:[%s1614_s30 + $0x58] sm:$0xff]   ;;  %s1723_s12 = scalar_lea.vmem %s1809_s4, %s1177_s9 }
  0x22   : > { %865 = vmatprep.mubr.bf16.mxu1 %v1477_v1  ;;  %v1456_v2 = vld [vmem:[%s1614_s30 + $0x40] sm:$0xff]   ;;  %v1459_v5 = vld [vmem:[%s1614_s30 + $0x8] sm:$0xff]   ;;  %v1460_v6 = vld [vmem:[%s1614_s30 + $0x50] sm:$0xff]  }
  0x23   : > { %v1457_v3 = vld [vmem:[%s1614_s30] sm:$0xff]   ;;  %1263 = vmatprep.subr.bf16.mxu0 %v1456_v2  ;;  %1429 = vmatprep.subr.bf16.mxu1 %v1456_v2  ;;  %v1461_v7 = vld [vmem:[%s1614_s30 + $0x10] sm:$0xff]   ;;  %v1463_v9 = vld [vmem:[%s1614_s30 + $0x18] sm:$0xff]  }
  0x24   : > { %1264 = vmatpush3.bf16.msra.mxu0 %v1457_v3  ;;  %1437 = vmatpush3.bf16.msra.mxu1 %v1457_v3  ;;  %v1464_v10 = vld [vmem:[%s1614_s30 + $0x60] sm:$0xff]   ;;  %v1466_v12 = vld [vmem:[%s1614_s30 + $0x68] sm:$0xff]   ;;  %v1468_v14 = vld [vmem:[%s1614_s30 + $0x70] sm:$0xff]  }
  0x25   : > { %1265 = vmatprep.subr.bf16.mxu0 %v1458_v4  ;;  %1430 = vmatprep.subr.bf16.mxu1 %v1458_v4  ;;  %v1465_v11 = vld [vmem:[%s1614_s30 + $0x20] sm:$0xff]   ;;  %v1467_v13 = vld [vmem:[%s1614_s30 + $0x28] sm:$0xff]   ;;  %v1469_v15 = vld [vmem:[%s1614_s30 + $0x30] sm:$0xff]  }
  0x26   : > { %v1470_v16 = vld [vmem:[%s1614_s30 + $0x78] sm:$0xff]   ;;  %v1478_v18 = vld [vmem:[%s1614_s30 + $0x80] sm:$0xff]   ;;  %v1491_v23 = vld [vmem:[%s1614_s30 + $0x88] sm:$0xff]  }
  0x27   : > { %v1471_v17 = vld [vmem:[%s1614_s30 + $0x38] sm:$0xff]   ;;  %v1475_v20 = vld [vmem:[%s1607_s26 + $0x120] ss:$12 sps:$4 sm:$0xff]   ;;  %v1496_v32 = vld [vmem:[%s1607_s26 + $0x48] ss:$12 sps:$4 sm:$0xff]  }
  0x28   : > { %1266 = vmatpush3.bf16.msra.mxu0 %v1459_v5  ;;  %1438 = vmatpush3.bf16.msra.mxu1 %v1459_v5  ;;  %v1481_v22 = vld [vmem:[%s1607_s26 + $0x13c] ss:$12 sps:$4 sm:$0xff]   ;;  %v1483_v24 = vld [vmem:[%s1607_s26 + $0x18] ss:$12 sps:$4 sm:$0xff]   ;;  %v1485_v26 = vld [vmem:[%s1607_s26 + $0x34] ss:$12 sps:$4 sm:$0xff]  }
  0x29   : > { %1267 = vmatprep.subr.bf16.mxu0 %v1460_v6  ;;  %1431 = vmatprep.subr.bf16.mxu1 %v1460_v6  ;;  %v1484_v25 = vld [vmem:[%s1607_s26 + $0x138] ss:$12 sps:$4 sm:$0xff]   ;;  %v1487_v27 = vld [vmem:[%s1607_s26 + $0x154] ss:$12 sps:$4 sm:$0xff]   ;;  %v1489_v28 = vld [vmem:[%s1607_s26 + $0x30] ss:$12 sps:$4 sm:$0xff]  }
  0x2a   : > { %v1490_v29 = vld [vmem:[%s1607_s26 + $0x150] ss:$12 sps:$4 sm:$0xff]   ;;  %v1492_v30 = vld [vmem:[%s1607_s26 + $0x4c] ss:$12 sps:$4 sm:$0xff]   ;;  %v1497_v33 = vld [vmem:[%s1607_s26 + $0x168] ss:$12 sps:$4 sm:$0xff]  }
  0x2b   : > { %v1494_v31 = vld [vmem:[%s1607_s26 + $0x16c] ss:$12 sps:$4 sm:$0xff]   ;;  %v1498_v34 = vld [vmem:[%s1607_s26 + $0x64] ss:$12 sps:$4 sm:$0xff]   ;;  %v1500_v35 = vld [vmem:[%s1607_s26 + $0x8] ss:$12 sps:$4 sm:$0xff]  }
  0x2c   : > { %1268 = vmatpush3.bf16.msra.mxu0 %v1461_v7  ;;  %1439 = vmatpush3.bf16.msra.mxu1 %v1461_v7  ;;  %v1501_v36 = vld [vmem:[%s1607_s26 + $0x60] ss:$12 sps:$4 sm:$0xff]   ;;  %v1503_v38 = vld [vmem:[%s1607_s26 + $0x7c] ss:$12 sps:$4 sm:$0xff]   ;;  %v1505_v39 = vld [vmem:[%s1607_s26 + $0x38] ss:$12 sps:$4 sm:$0xff]  }
  0x2d   : > { %1269 = vmatprep.subr.bf16.mxu0 %v1462_v8  ;;  %1432 = vmatprep.subr.bf16.mxu1 %v1462_v8  ;;  %v1502_v37 = vld [vmem:[%s1607_s26 + $0x20] ss:$12 sps:$4 sm:$0xff]   ;;  %v1506_v40 = vld [vmem:[%s1607_s26 + $0x78] ss:$12 sps:$4 sm:$0xff]   ;;  %v1507_v41 = vld [vmem:[%s1607_s26 + $0x50] ss:$12 sps:$4 sm:$0xff]  }
  0x2e   : > { %v1508_v42 = vld [vmem:[%s1607_s26 + $0x94] ss:$12 sps:$4 sm:$0xff]   ;;  %v1511_v44 = vld [vmem:[%s1607_s26 + $0x90] ss:$12 sps:$4 sm:$0xff]   ;;  %v1513_v46 = vld [vmem:[%s1607_s26 + $0xac] ss:$12 sps:$4 sm:$0xff]  }
  0x2f   : > { %v1510_v43 = vld [vmem:[%s1607_s26 + $0x68] ss:$12 sps:$4 sm:$0xff]   ;;  %v1512_v45 = vld [vmem:[%s1607_s26 + $0x80] ss:$12 sps:$4 sm:$0xff]   ;;  %v1515_v47 = vld [vmem:[%s1607_s26 + $0x98] ss:$12 sps:$4 sm:$0xff]  }
  0x30   : > { %1270 = vmatpush3.bf16.msra.mxu0 %v1463_v9  ;;  %1440 = vmatpush3.bf16.msra.mxu1 %v1463_v9  ;;  %v1516_v48 = vld [vmem:[%s1607_s26 + $0xa8] ss:$12 sps:$4 sm:$0xff]   ;;  %v1517_v49 = vld [vmem:[%s1607_s26 + $0xb0] ss:$12 sps:$4 sm:$0xff]   ;;  %v1521_v52 = vld [vmem:[%s1607_s26 + $0xc0] ss:$12 sps:$4 sm:$0xff]  }
  0x31   : > { %1271 = vmatprep.subr.bf16.mxu0 %v1464_v10  ;;  %1433 = vmatprep.subr.bf16.mxu1 %v1464_v10  ;;  %v1518_v50 = vld [vmem:[%s1607_s26 + $0xc4] ss:$12 sps:$4 sm:$0xff]   ;;  %v1520_v51 = vld [vmem:[%s1607_s26 + $0xc8] ss:$12 sps:$4 sm:$0xff]   ;;  %v1522_v53 = vld [vmem:[%s1607_s26 + $0xe0] ss:$12 sps:$4 sm:$0xff]  }
  0x32   : > { %v1523_v54 = vld [vmem:[%s1607_s26 + $0xdc] ss:$12 sps:$4 sm:$0xff]   ;;  %v1525_v55 = vld [vmem:[%s1607_s26 + $0xf8] ss:$12 sps:$4 sm:$0xff]   ;;  %v1528_v58 = vld [vmem:[%s1607_s26 + $0xf4] ss:$12 sps:$4 sm:$0xff]  }
  0x33   : > { %v1526_v56 = vld [vmem:[%s1607_s26 + $0xd8] ss:$12 sps:$4 sm:$0xff]   ;;  %v1527_v57 = vld [vmem:[%s1607_s26 + $0x110] ss:$12 sps:$4 sm:$0xff]   ;;  %v1530_v59 = vld [vmem:[%s1607_s26 + $0x128] ss:$12 sps:$4 sm:$0xff]  }
  0x34   : > { %1272 = vmatpush3.bf16.msra.mxu0 %v1465_v11  ;;  %1441 = vmatpush3.bf16.msra.mxu1 %v1465_v11  ;;  %v1531_v60 = vld [vmem:[%s1607_s26 + $0xf0] ss:$12 sps:$4 sm:$0xff]   ;;  %v1532_v61 = vld [vmem:[%s1607_s26 + $0x140] ss:$12 sps:$4 sm:$0xff]   ;;  %v1535_v63 = vld [vmem:[%s1607_s26 + $0x158] ss:$12 sps:$4 sm:$0xff]  }
  0x35   : > { %1273 = vmatprep.subr.bf16.mxu0 %v1466_v12  ;;  %1434 = vmatprep.subr.bf16.mxu1 %v1466_v12  ;;  %v1533_v62 = vld [vmem:[%s1607_s26 + $0x10c] ss:$12 sps:$4 sm:$0xff]   ;;  %v1536_v0 = vld [vmem:[%s1607_s26 + $0x108] ss:$12 sps:$4 sm:$0xff]   ;;  %v1537_v1 = vld [vmem:[%s1607_s26 + $0x170] ss:$12 sps:$4 sm:$0xff]  }
  0x38   : > { %1274 = vmatpush3.bf16.msra.mxu0 %v1467_v13  ;;  %1442 = vmatpush3.bf16.msra.mxu1 %v1467_v13 }
  0x39   : > { %1275 = vmatprep.subr.bf16.mxu0 %v1468_v14  ;;  %1435 = vmatprep.subr.bf16.mxu1 %v1468_v14 }
  0x3c   : > { %1276 = vmatpush3.bf16.msra.mxu0 %v1469_v15  ;;  %1443 = vmatpush3.bf16.msra.mxu1 %v1469_v15 }
  0x3d   : > { %1277 = vmatprep.subr.bf16.mxu0 %v1470_v16  ;;  %1436 = vmatprep.subr.bf16.mxu1 %v1470_v16 }
  0x40   : > { %1278 = vmatpush3.bf16.msra.mxu0 %v1471_v17  ;;  %1444 = vmatpush3.bf16.msra.mxu1 %v1471_v17 }
  0x41   : > { %1393 = vmatprep.subr.bf16.mxu1 %v1478_v18 }
  0x43   : > { %770 = vmatmul.mubr.bf16.vlgmr.msra.gmra.mrb[0].mxu0 %v1472_v19  ;;  %866 = vmatmul.mubr.bf16.vlgmr.msra.gmra.mrb[0].mxu1 %v1475_v20 }
  0x44   : > { %1394 = vmatpush3.bf16.msra.mxu1 %v1478_v18  ;;  %777 = vmatprep.mubr.bf16.mxu0 %v1479_v21 }
  0x45   : > { %873 = vmatprep.mubr.bf16.mxu1 %v1481_v22  ;;  %1395 = vmatprep.subr.bf16.mxu1 %v1491_v23 }
  0x48   : > { %1396 = vmatpush3.bf16.msra.mxu1 %v1491_v23 }
  0x4b   : > { %778 = vmatmul.mubr.bf16.gmra.mrb[4].mxu0 %v1483_v24  ;;  %874 = vmatmul.mubr.bf16.gmra.mrb[4].mxu1 %v1484_v25 }
  0x4c   : > { %785 = vmatprep.mubr.bf16.mxu0 %v1485_v26  ;;  %881 = vmatprep.mubr.bf16.mxu1 %v1487_v27 }
  0x53   : > { %786 = vmatmul.mubr.bf16.gmra.mrb[8].mxu0 %v1489_v28  ;;  %882 = vmatmul.mubr.bf16.gmra.mrb[8].mxu1 %v1490_v29 }
  0x54   : > { %793 = vmatprep.mubr.bf16.mxu0 %v1492_v30  ;;  %889 = vmatprep.mubr.bf16.mxu1 %v1494_v31 }
  0x5b   : > { %794 = vmatmul.mubr.bf16.gmra.mrb[12].mxu0 %v1496_v32  ;;  %890 = vmatmul.mubr.bf16.gmra.mrb[12].mxu1 %v1497_v33 }
  0x5c   : > { %801 = vmatprep.mubr.bf16.mxu0 %v1498_v34  ;;  %1397 = vmatprep.mubr.msk.bf16.mxu1 %vm688_vm0, %v1500_v35 }
  0x63   : > { %802 = vmatmul.mubr.bf16.gmra.mrb[16].mxu0 %v1501_v36  ;;  %1398 = vmatmul.mubr.msk.bf16.vlgmr.msra.gmra.mrb[16].mxu1 %vm688_vm0, %v1502_v37 }
  0x64   : > { %809 = vmatprep.mubr.bf16.mxu0 %v1503_v38  ;;  %1401 = vmatprep.mubr.msk.bf16.mxu1 %vm688_vm0, %v1505_v39 }
  0x6b   : > { %810 = vmatmul.mubr.bf16.gmra.mrb[20].mxu0 %v1506_v40  ;;  %1402 = vmatmul.mubr.msk.bf16.gmra.mrb[20].mxu1 %vm688_vm0, %v1507_v41 }
  0x6c   : > { %817 = vmatprep.mubr.bf16.mxu0 %v1508_v42  ;;  %1405 = vmatprep.mubr.msk.bf16.mxu1 %vm688_vm0, %v1510_v43 }
  0x73   : > { %818 = vmatmul.mubr.bf16.gmra.mrb[24].mxu0 %v1511_v44  ;;  %1406 = vmatmul.mubr.msk.bf16.gmra.mrb[24].mxu1 %vm688_vm0, %v1512_v45 }
  0x74   : > { %825 = vmatprep.mubr.bf16.mxu0 %v1513_v46  ;;  %1409 = vmatprep.mubr.msk.bf16.mxu1 %vm688_vm0, %v1515_v47 }
  0x7b   : > { %826 = vmatmul.mubr.bf16.gmra.mrb[28].mxu0 %v1516_v48  ;;  %1410 = vmatmul.mubr.msk.bf16.gmra.mrb[28].mxu1 %vm688_vm0, %v1517_v49 }
  0x7c   : > { %833 = vmatprep.mubr.bf16.mxu0 %v1518_v50  ;;  %1413 = vmatprep.mubr.msk.bf16.mxu1 %vm688_vm0, %v1520_v51  ;;  %v1717_v50 = vld [vmem:[%s224_s8] ss:$0 sm:$0xff] }
  0x83   : > { %834 = vmatmul.mubr.bf16.gmra.mrb[32].mxu0 %v1521_v52  ;;  %1414 = vmatmul.mubr.msk.bf16.gmra.mrb[32].mxu1 %vm688_vm0, %v1522_v53 }
  0x84   : > { %841 = vmatprep.mubr.bf16.mxu0 %v1523_v54  ;;  %1417 = vmatprep.mubr.msk.bf16.mxu1 %vm688_vm0, %v1525_v55 }
  0x8b   : > { %842 = vmatmul.mubr.bf16.gmra.mrb[36].mxu0 %v1526_v56  ;;  %1418 = vmatmul.mubr.msk.bf16.gmra.mrb[36].mxu1 %vm688_vm0, %v1527_v57 }
  0x8c   : > { %849 = vmatprep.mubr.bf16.mxu0 %v1528_v58  ;;  %1421 = vmatprep.mubr.msk.bf16.mxu1 %vm688_vm0, %v1530_v59 }
  0x93   : > { %850 = vmatmul.mubr.bf16.gmra.mrb[40].mxu0 %v1531_v60  ;;  %1422 = vmatmul.mubr.msk.bf16.gmra.mrb[40].mxu1 %vm688_vm0, %v1532_v61 }
  0x94   : > { %857 = vmatprep.mubr.bf16.mxu0 %v1533_v62  ;;  %1425 = vmatprep.mubr.msk.bf16.mxu1 %vm688_vm0, %v1535_v63 }
  0x9b   : > { %858 = vmatmul.mubr.bf16.gmra.mrb[44].mxu0 %v1536_v0  ;;  %1426 = vmatmul.mubr.msk.bf16.gmra.mrb[44].mxu1 %vm688_vm0, %v1537_v1 }
 0x116   : > { %v1279_v2 = vpop.f32.mrb[0].mxu0  ;;  %v1351_v3 = vpop.f32.mrb[0].mxu1 }
 0x117   : > { %v1280_v4 = vpop.f32.mrb[1].mxu0  ;;  %v1352_v5 = vpop.f32.mrb[1].mxu1 }
 0x118   : > { %v1281_v6 = vadd.f32 %v1280_v4, %v1279_v2  ;;  %v1282_v7 = vpop.f32.mrb[2].mxu0  ;;  %v1696_v8 = vadd.f32 %v1352_v5, %v1351_v3  ;;  %v1354_v9 = vpop.f32.mrb[2].mxu1 }
 0x119   : > { %v1283_v10 = vpop.f32.mrb[3].mxu0  ;;  %v1355_v11 = vpop.f32.mrb[3].mxu1 }
 0x11a   : > { %v1284_v12 = vadd.f32 %v1283_v10, %v1282_v7  ;;  %v1698_v13 = vadd.f32 %v1355_v11, %v1354_v9  ;;  %v772_v54 = vadd.f32 %v1281_v6, %v1717_v50 }
 0x11c   : > { %v775_v63 = vadd.f32 %v1284_v12, %v1717_v50 }
 0x11e   : > { %v1285_v14 = vpop.f32.mrb[4].mxu0  ;;  %v1357_v15 = vpop.f32.mrb[4].mxu1 }
 0x11f   : > { %v1286_v16 = vpop.f32.mrb[5].mxu0  ;;  %v1358_v17 = vpop.f32.mrb[5].mxu1 }
 0x120   : > { %v1287_v18 = vadd.f32 %v1286_v16, %v1285_v14  ;;  %v1288_v19 = vpop.f32.mrb[6].mxu0  ;;  %v1700_v20 = vadd.f32 %v1358_v17, %v1357_v15  ;;  %v1360_v21 = vpop.f32.mrb[6].mxu1 }
 0x121   : > { %v1289_v22 = vpop.f32.mrb[7].mxu0  ;;  %v1361_v23 = vpop.f32.mrb[7].mxu1 }
 0x122   : > { %v1290_v24 = vadd.f32 %v1289_v22, %v1288_v19  ;;  %v1703_v25 = vadd.f32 %v1361_v23, %v1360_v21  ;;  %v780_v51 = vadd.f32 %v1287_v18, %v1717_v50 }
 0x124   : > { %v783_v58 = vadd.f32 %v1290_v24, %v1717_v50 }
 0x126   : > { %v1291_v26 = vpop.f32.mrb[8].mxu0  ;;  %v1363_v27 = vpop.f32.mrb[8].mxu1 }
 0x127   : > { %v1292_v28 = vpop.f32.mrb[9].mxu0  ;;  %v1364_v29 = vpop.f32.mrb[9].mxu1 }
 0x128   : > { %v1293_v30 = vadd.f32 %v1292_v28, %v1291_v26  ;;  %v1294_v31 = vpop.f32.mrb[10].mxu0  ;;  %v1705_v32 = vadd.f32 %v1364_v29, %v1363_v27  ;;  %v1366_v33 = vpop.f32.mrb[10].mxu1 }
 0x129   : > { %v1295_v34 = vpop.f32.mrb[11].mxu0  ;;  %v1367_v35 = vpop.f32.mrb[11].mxu1 }
 0x12a   : > { %v1296_v36 = vadd.f32 %v1295_v34, %v1294_v31  ;;  %v1707_v37 = vadd.f32 %v1367_v35, %v1366_v33  ;;  %v788_v9 = vadd.f32 %v1293_v30, %v1717_v50 }
 0x12c   : > { %v791_v19 = vadd.f32 %v1296_v36, %v1717_v50 }
 0x12e   : > { %v1297_v38 = vpop.f32.mrb[12].mxu0  ;;  %v1369_v39 = vpop.f32.mrb[12].mxu1 }
 0x12f   : > { %v1298_v40 = vpop.f32.mrb[13].mxu0  ;;  %v1370_v41 = vpop.f32.mrb[13].mxu1 }
 0x130   : > { %v1299_v42 = vadd.f32 %v1298_v40, %v1297_v38  ;;  %v1300_v43 = vpop.f32.mrb[14].mxu0  ;;  %v1709_v44 = vadd.f32 %v1370_v41, %v1369_v39  ;;  %v1372_v45 = vpop.f32.mrb[14].mxu1 }
 0x131   : > { %v1301_v46 = vpop.f32.mrb[15].mxu0  ;;  %v1373_v47 = vpop.f32.mrb[15].mxu1 }
 0x132   : > { %v1302_v48 = vadd.f32 %v1301_v46, %v1300_v43  ;;  %v1714_v49 = vadd.f32 %v1373_v47, %v1372_v45  ;;  %v796_v5 = vadd.f32 %v1299_v42, %v1717_v50 }
 0x134   : > { %v799_v14 = vadd.f32 %v1302_v48, %v1717_v50 }
 0x136   : > { %v1303_v52 = vpop.f32.mrb[16].mxu0  ;;  %v1399_v53 = vpop.f32.mrb[16].mxu1 }
 0x137   : > { %v941_v55 = vadd.f32 %v1399_v53, %v780_v51  ;;  %v1304_v56 = vpop.f32.mrb[17].mxu0  ;;  %v932_v57 = vpop.f32.mrb[17].mxu1 }
 0x138   : > { %v1305_v59 = vadd.f32 %v1304_v56, %v1303_v52  ;;  %v933_v60 = vadd.f32 %v932_v57, %v772_v54  ;;  %v1306_v61 = vpop.f32.mrb[18].mxu0  ;;  %v1400_v62 = vpop.f32.mrb[18].mxu1 }
 0x139   : > { %1061 = vst [vmem:[%s1723_s12 + $0x10] sm:$0xff] %v941_v55  ;;  %v944_v0 = vadd.f32 %v1400_v62, %v783_v58  ;;  %v1307_v1 = vpop.f32.mrb[19].mxu0  ;;  %v935_v2 = vpop.f32.mrb[19].mxu1 }
 0x13a   : > { %1059 = vst [vmem:[%s1723_s12] sm:$0xff] %v933_v60  ;;  %v1308_v3 = vadd.f32 %v1307_v1, %v1306_v61  ;;  %v936_v4 = vadd.f32 %v935_v2, %v775_v63  ;;  %v804_v30 = vadd.f32 %v1305_v59, %v1717_v50 }
 0x13b   : > { %1062 = vst [vmem:[%s1723_s12 + $0x18] sm:$0xff] %v944_v0 }
 0x13c   : > { %1060 = vst [vmem:[%s1723_s12 + $0x8] sm:$0xff] %v936_v4  ;;  %v807_v41 = vadd.f32 %v1308_v3, %v1717_v50 }
 0x13e   : > { %v1309_v6 = vpop.f32.mrb[20].mxu0  ;;  %v1403_v7 = vpop.f32.mrb[20].mxu1 }
 0x13f   : > { %v957_v10 = vadd.f32 %v1403_v7, %v796_v5  ;;  %v1310_v11 = vpop.f32.mrb[21].mxu0  ;;  %v948_v12 = vpop.f32.mrb[21].mxu1 }
 0x140   : > { %v1311_v15 = vadd.f32 %v1310_v11, %v1309_v6  ;;  %v949_v16 = vadd.f32 %v948_v12, %v788_v9  ;;  %v1312_v17 = vpop.f32.mrb[22].mxu0  ;;  %v1404_v18 = vpop.f32.mrb[22].mxu1 }
 0x141   : > { %1065 = vst [vmem:[%s1723_s12 + $0x30] sm:$0xff] %v957_v10  ;;  %v960_v21 = vadd.f32 %v1404_v18, %v799_v14  ;;  %v1313_v22 = vpop.f32.mrb[23].mxu0  ;;  %v951_v23 = vpop.f32.mrb[23].mxu1 }
 0x142   : > { %1063 = vst [vmem:[%s1723_s12 + $0x20] sm:$0xff] %v949_v16  ;;  %v1314_v24 = vadd.f32 %v1313_v22, %v1312_v17  ;;  %v952_v26 = vadd.f32 %v951_v23, %v791_v19  ;;  %v812_v27 = vadd.f32 %v1311_v15, %v1717_v50 }
 0x143   : > { %1066 = vst [vmem:[%s1723_s12 + $0x38] sm:$0xff] %v960_v21 }
 0x144   : > { %1064 = vst [vmem:[%s1723_s12 + $0x28] sm:$0xff] %v952_v26  ;;  %v815_v35 = vadd.f32 %v1314_v24, %v1717_v50 }
 0x146   : > { %v1315_v28 = vpop.f32.mrb[24].mxu0  ;;  %v1407_v29 = vpop.f32.mrb[24].mxu1 }
 0x147   : > { %v973_v31 = vadd.f32 %v1407_v29, %v812_v27  ;;  %v1316_v33 = vpop.f32.mrb[25].mxu0  ;;  %v964_v34 = vpop.f32.mrb[25].mxu1 }
 0x148   : > { %v1317_v36 = vadd.f32 %v1316_v33, %v1315_v28  ;;  %v965_v38 = vadd.f32 %v964_v34, %v804_v30  ;;  %v1318_v39 = vpop.f32.mrb[26].mxu0  ;;  %v1408_v40 = vpop.f32.mrb[26].mxu1 }
 0x149   : > { %1069 = vst [vmem:[%s1723_s12 + $0x50] sm:$0xff] %v973_v31  ;;  %v976_v42 = vadd.f32 %v1408_v40, %v815_v35  ;;  %v1319_v43 = vpop.f32.mrb[27].mxu0  ;;  %v967_v45 = vpop.f32.mrb[27].mxu1 }
 0x14a   : > { %1067 = vst [vmem:[%s1723_s12 + $0x40] sm:$0xff] %v965_v38  ;;  %v1320_v46 = vadd.f32 %v1319_v43, %v1318_v39  ;;  %v968_v47 = vadd.f32 %v967_v45, %v807_v41  ;;  %v820_v52 = vadd.f32 %v1317_v36, %v1717_v50  ;;  %v876_v36 = vadd.f32 %v1700_v20, %v1717_v50 }
 0x14b   : > { %1070 = vst [vmem:[%s1723_s12 + $0x58] sm:$0xff] %v976_v42  ;;  %v868_v41 = vadd.f32 %v1696_v8, %v1717_v50 }
 0x14c   : > { %1068 = vst [vmem:[%s1723_s12 + $0x48] sm:$0xff] %v968_v47  ;;  %v823_v59 = vadd.f32 %v1320_v46, %v1717_v50  ;;  %v879_v46 = vadd.f32 %v1703_v25, %v1717_v50 }
 0x14e   : > { %v1321_v48 = vpop.f32.mrb[28].mxu0  ;;  %v1411_v51 = vpop.f32.mrb[28].mxu1 }
 0x14f   : > { %v1322_v53 = vpop.f32.mrb[29].mxu0  ;;  %v980_v54 = vpop.f32.mrb[29].mxu1 }
 0x150   : > { %v1323_v55 = vadd.f32 %v1322_v53, %v1321_v48  ;;  %v981_v56 = vadd.f32 %v980_v54, %v820_v52  ;;  %v1324_v57 = vpop.f32.mrb[30].mxu0  ;;  %v1412_v58 = vpop.f32.mrb[30].mxu1  ;;  %v871_v52 = vadd.f32 %v1698_v13, %v1717_v50 }
 0x151   : > { %v1325_v60 = vpop.f32.mrb[31].mxu0  ;;  %v983_v61 = vpop.f32.mrb[31].mxu1 }
 0x152   : > { %v828_v62 = vadd.f32 %v1323_v55, %v1717_v50  ;;  %1071 = vst [vmem:[%s1723_s12 + $0x60] sm:$0xff] %v981_v56  ;;  %v1326_v63 = vadd.f32 %v1325_v60, %v1324_v57  ;;  %v984_v0 = vadd.f32 %v983_v61, %v823_v59  ;;  %v892_v59 = vadd.f32 %v1709_v44, %v1717_v50 }
 0x154   : > { %v989_v1 = vadd.f32 %v1411_v51, %v828_v62  ;;  %v831_v2 = vadd.f32 %v1326_v63, %v1717_v50  ;;  %1072 = vst [vmem:[%s1723_s12 + $0x68] sm:$0xff] %v984_v0  ;;  %v884_v62 = vadd.f32 %v1705_v32, %v1717_v50 }
 0x156   : > { %1073 = vst [vmem:[%s1723_s12 + $0x70] sm:$0xff] %v989_v1  ;;  %v992_v3 = vadd.f32 %v1412_v58, %v831_v2  ;;  %v1327_v4 = vpop.f32.mrb[32].mxu0  ;;  %v1415_v5 = vpop.f32.mrb[32].mxu1  ;;  %v895_v2 = vadd.f32 %v1714_v49, %v1717_v50 }
 0x157   : > { %v1328_v6 = vpop.f32.mrb[33].mxu0  ;;  %v996_v7 = vpop.f32.mrb[33].mxu1 }
 0x158   : > { %1074 = vst [vmem:[%s1723_s12 + $0x78] sm:$0xff] %v992_v3  ;;  %v1329_v9 = vadd.f32 %v1328_v6, %v1327_v4  ;;  %v1330_v10 = vpop.f32.mrb[34].mxu0  ;;  %v1416_v11 = vpop.f32.mrb[34].mxu1  ;;  %v887_v6 = vadd.f32 %v1707_v37, %v1717_v50 }
 0x159   : > { %v1331_v12 = vpop.f32.mrb[35].mxu0  ;;  %v999_v14 = vpop.f32.mrb[35].mxu1 }
 0x15a   : > { %v836_v15 = vadd.f32 %v1329_v9, %v1717_v50  ;;  %v1332_v16 = vadd.f32 %v1331_v12, %v1330_v10 }
 0x15c   : > { %v997_v17 = vadd.f32 %v996_v7, %v836_v15  ;;  %v839_v18 = vadd.f32 %v1332_v16, %v1717_v50 }
 0x15e   : > { %1075 = vst [vmem:[%s1723_s12 + $0x80] sm:$0xff] %v997_v17  ;;  %v1000_v19 = vadd.f32 %v999_v14, %v839_v18  ;;  %v1333_v21 = vpop.f32.mrb[36].mxu0  ;;  %v1759_v22 = vpop.f32.mrb[36].mxu1 }
 0x15f   : > { %v1334_v23 = vpop.f32.mrb[37].mxu0  ;;  %v1012_v24 = vpop.f32.mrb[37].mxu1 }
 0x160   : > { %1076 = vst [vmem:[%s1723_s12 + $0x88] sm:$0xff] %v1000_v19  ;;  %v1335_v26 = vadd.f32 %v1334_v23, %v1333_v21  ;;  %v1336_v27 = vpop.f32.mrb[38].mxu0  ;;  %v1762_v28 = vpop.f32.mrb[38].mxu1 }
 0x161   : > { %v1337_v29 = vpop.f32.mrb[39].mxu0  ;;  %v1015_v30 = vpop.f32.mrb[39].mxu1 }
 0x162   : > { %v844_v31 = vadd.f32 %v1335_v26, %v1717_v50  ;;  %v1338_v33 = vadd.f32 %v1337_v29, %v1336_v27 }
 0x164   : > { %v1005_v34 = vadd.f32 %v1415_v5, %v844_v31  ;;  %v847_v35 = vadd.f32 %v1338_v33, %v1717_v50 }
 0x166   : > { %1077 = vst [vmem:[%s1723_s12 + $0x90] sm:$0xff] %v1005_v34  ;;  %v1008_v38 = vadd.f32 %v1416_v11, %v847_v35  ;;  %v1339_v39 = vpop.f32.mrb[40].mxu0  ;;  %v1423_v40 = vpop.f32.mrb[40].mxu1 }
 0x167   : > { %v1037_v42 = vadd.f32 %v1423_v40, %v876_v36  ;;  %v1340_v43 = vpop.f32.mrb[41].mxu0  ;;  %v1028_v45 = vpop.f32.mrb[41].mxu1 }
 0x168   : > { %1078 = vst [vmem:[%s1723_s12 + $0x98] sm:$0xff] %v1008_v38  ;;  %v1341_v47 = vadd.f32 %v1340_v43, %v1339_v39  ;;  %v1029_v20 = vadd.f32 %v1028_v45, %v868_v41  ;;  %v1342_v48 = vpop.f32.mrb[42].mxu0  ;;  %v1424_v51 = vpop.f32.mrb[42].mxu1 }
 0x169   : > { %1085 = vst [vmem:[%s1723_s12 + $0xd0] sm:$0xff] %v1037_v42  ;;  %v1040_v8 = vadd.f32 %v1424_v51, %v879_v46  ;;  %v1343_v53 = vpop.f32.mrb[43].mxu0  ;;  %v1031_v54 = vpop.f32.mrb[43].mxu1 }
 0x16a   : > { %v852_v55 = vadd.f32 %v1341_v47, %v1717_v50  ;;  %1083 = vst [vmem:[%s1723_s12 + $0xc0] sm:$0xff] %v1029_v20  ;;  %v1344_v56 = vadd.f32 %v1343_v53, %v1342_v48  ;;  %v1032_v25 = vadd.f32 %v1031_v54, %v871_v52 }
 0x16b   : > { %1086 = vst [vmem:[%s1723_s12 + $0xd8] sm:$0xff] %v1040_v8 }
 0x16c   : > { %v1013_v57 = vadd.f32 %v1012_v24, %v852_v55  ;;  %v855_v58 = vadd.f32 %v1344_v56, %v1717_v50  ;;  %1084 = vst [vmem:[%s1723_s12 + $0xc8] sm:$0xff] %v1032_v25 }
 0x16e   : > { %1079 = vst [vmem:[%s1723_s12 + $0xa0] sm:$0xff] %v1013_v57  ;;  %v1016_v13 = vadd.f32 %v1015_v30, %v855_v58  ;;  %v1345_v60 = vpop.f32.mrb[44].mxu0  ;;  %v1427_v61 = vpop.f32.mrb[44].mxu1 }
 0x16f   : > { %v1053_v63 = vadd.f32 %v1427_v61, %v892_v59  ;;  %v1346_v0 = vpop.f32.mrb[45].mxu0  ;;  %v1044_v1 = vpop.f32.mrb[45].mxu1 }
 0x170   : > { %1080 = vst [vmem:[%s1723_s12 + $0xa8] sm:$0xff] %v1016_v13  ;;  %v1347_v3 = vadd.f32 %v1346_v0, %v1345_v60  ;;  %v1045_v44 = vadd.f32 %v1044_v1, %v884_v62  ;;  %v1348_v4 = vpop.f32.mrb[46].mxu0  ;;  %v1428_v5 = vpop.f32.mrb[46].mxu1 }
 0x171   : > { %1089 = vst [vmem:[%s1723_s12 + $0xf0] sm:$0xff] %v1053_v63  ;;  %v1056_v32 = vadd.f32 %v1428_v5, %v895_v2  ;;  %v1349_v7 = vpop.f32.mrb[47].mxu0  ;;  %v1047_v9 = vpop.f32.mrb[47].mxu1 }
 0x172   : > { %v860_v10 = vadd.f32 %v1347_v3, %v1717_v50  ;;  %1087 = vst [vmem:[%s1723_s12 + $0xe0] sm:$0xff] %v1045_v44  ;;  %v1350_v11 = vadd.f32 %v1349_v7, %v1348_v4  ;;  %v1048_v49 = vadd.f32 %v1047_v9, %v887_v6 }
 0x173   : > { %1090 = vst [vmem:[%s1723_s12 + $0xf8] sm:$0xff] %v1056_v32 }
 0x174   : > { %v1021_v12 = vadd.f32 %v1759_v22, %v860_v10  ;;  %v863_v14 = vadd.f32 %v1350_v11, %v1717_v50  ;;  %1088 = vst [vmem:[%s1723_s12 + $0xe8] sm:$0xff] %v1048_v49 }
 0x176   : > { %1081 = vst [vmem:[%s1723_s12 + $0xb0] sm:$0xff] %v1021_v12  ;;  %v1024_v15 = vadd.f32 %v1762_v28, %v863_v14 }
 0x178   : > { %1082 = vst [vmem:[%s1723_s12 + $0xb8] sm:$0xff] %v1024_v15 }
 0x179 PF: > { %s20_s20 = sadd.s32 1, %s1558_s20  }
 0x17a   : > { %p17_p11 = scmp.ge.s32.totalorder %s20_s20, 15  }
 0x17c   :  { %19 = sbr.rel (!%p17_p11) target bundleno = 16 (0x10), region = 68 }

// kernel: a_call__.4
= control target key start
LH: loop header
LB: loop body
LE: loop exit
PB: predicated region body
PF: predicated region fallthrough
CT: control target
= control target key end

     0   :  { %s2658_s0 = inlined_call_operand.vmem [shape: s32[3], index: 0, kind: input, shape index: {}]   ;;  %s2659_s1 = inlined_call_operand.vmem [shape: bf16[768,576], index: 1, kind: input, shape index: {}]   ;;  %s2660_s2 = inlined_call_operand.vmem [shape: bf16[1,576,128], index: 2, kind: input, shape index: {}]   ;;  %s2661_s3 = inlined_call_operand.vmem [shape: f32[1,1,128], index: 3, kind: input, shape index: {}]   ;;  %s2662_s4 = inlined_call_operand.vmem [shape: f32[768,128], index: 4, kind: output, shape index: {}]  }
   0x1   :  { %s9_s17 = sshll.u32 %s2658_s0, 4  ;;  %s10_s17 = int_to_ptr.vmem [resolvable:$true] %s9_s17 }
   0x2   :  { %s2269_s18 = scalar_lea.vmem %s10_s17, 16  ;;  %p2274_p1 = scmp.lt.s32.totalorder %s10_s17, %s10_s17 }
   0x3   :  { %p2270_p0 = scmp.ne.s32.totalorder %s10_s17, %s2269_s18  ;;  %p2275_p2 = scmp.lt.s32.totalorder %s2269_s18, %s2269_s18 }
   0x5   :  { %p2276_p3 = por %p2275_p2, %p2274_p1 }
   0x7   :  { %p2277_p4 = pnand %p2276_p3, %p2270_p0 }
   0x9   :  { %2280 = shalt.err (!%p2277_p4)  }
   0xa   :  { %s2291_s19 = smov [#allocation3]  }
   0xb   :  { %12 = dma.vmem_to_smem %s10_s17, 16, %s2291_s19, [#allocation2] }
   0xc   :  { %2285 = dma.done.wait [#allocation2], 16 }
   0xd   :  { %2286 = vsyncadd [#allocation2], 4294967280 }
   0xe   :  { %14 = sfence }
   0xf   :  { %s2320_s20 = smov 0  }
  0x10 LB: > { %s2326_s0 = sadd.s32 4294967295, %s2289_s20   ;;  %p1669_p5 = scmp.ge.s32.totalorder %s2289_s20, 1  ;;  %s2289_s20 = sphi %s2320_s20, %s20_s20  }
  0x11   : > { %p172_p6 = scmp.lt.s32.totalorder %s2289_s20, 4 }
  0x13   : > { %p173_p7 = pnand %p1669_p5, %p172_p6 }
  0x14   : > { %s214_s21 = sld [smem:[#allocation3 + %s2326_s0]] (!%p173_p7)  ;;  %s1670_s22 = sshll.u32 (!%p173_p7), %s2326_s0, 5  ;;  %vm1024_vm0 = vcmask (!%p173_p7), 523264  }
  0x15   : > { %176 = sbr.rel (%p173_p7) target bundleno = 441 (0x1b9), region = 32  ;;  %p208_p8 = scmp.lt.s32.totalorder (!%p173_p7), %s1670_s22, 95 }
  0x16   : > { %s221_s5 = sld [smem:[#allocation3 + %s2326_s0]] (!%p173_p7) }
  0x1a   : > { %p215_p9 = scmp.lt.s32.totalorder (!%p173_p7), %s214_s21, 0 }
  0x1c   : > { %s2664_s22 = smov (!%p208_p8, %s1670_s22), 95  ;;  %s2666_s21 = smov (!%p215_p9, %s214_s21), 0 }
  0x1d   : > { %s2110_s23 = smul.u32 20, %s2664_s22  ;;  %p222_p10 = scmp.lt.s32.totalorder %s221_s5, 0 }
  0x1e   : > { %s2111_s27 = smul.u32 288, %s2666_s21  ;;  %s1674_s9 = sshll.u32 %s2664_s22, 3 }
  0x1f   : > { %s2338_s26 = scalar_lea.vmem %s2659_s1, %s2110_s23  ;;  %s2668_s5 = smov (!%p222_p10, %s221_s5), 0 }
  0x20   : > { %v2139_v0 = vld [vmem:[%s2338_s26 + $0x4] ss:$20 sps:$4 sm:$0xff]   ;;  %s2345_s30 = scalar_lea.vmem %s2660_s2, %s2111_s27  ;;  %v2137_v19 = vld [vmem:[%s2338_s26] ss:$20 sps:$4 sm:$0xff]   ;;  %v2152_v27 = vld [vmem:[%s2338_s26 + $0x28] ss:$20 sps:$4 sm:$0xff]   ;;  %s224_s8 = scalar_lea.vmem %s2661_s3, %s2668_s5 }
  0x21   : > { %v2142_v1 = vld [vmem:[%s2338_s26 + $0x1e4] ss:$20 sps:$4 sm:$0xff]   ;;  %1105 = vmatprep.mubr.bf16.mxu0 %v2139_v0  ;;  %v2123_v4 = vld [vmem:[%s2345_s30 + $0x48] sm:$0xff]   ;;  %v2125_v6 = vld [vmem:[%s2345_s30 + $0x50] sm:$0xff]   ;;  %s2567_s12 = scalar_lea.vmem %s2662_s4, %s1674_s9 }
  0x22   : > { %1201 = vmatprep.mubr.bf16.mxu1 %v2142_v1  ;;  %v2121_v2 = vld [vmem:[%s2345_s30 + $0x40] sm:$0xff]   ;;  %v2124_v5 = vld [vmem:[%s2345_s30 + $0x8] sm:$0xff]   ;;  %v2126_v7 = vld [vmem:[%s2345_s30 + $0x10] sm:$0xff]  }
  0x23   : > { %v2122_v3 = vld [vmem:[%s2345_s30] sm:$0xff]   ;;  %1810 = vmatprep.subr.bf16.mxu0 %v2121_v2  ;;  %2094 = vmatprep.subr.bf16.mxu1 %v2121_v2  ;;  %v2127_v8 = vld [vmem:[%s2345_s30 + $0x58] sm:$0xff]   ;;  %v2131_v12 = vld [vmem:[%s2345_s30 + $0x68] sm:$0xff]  }
  0x24   : > { %1811 = vmatpush3.bf16.msra.mxu0 %v2122_v3  ;;  %2102 = vmatpush3.bf16.msra.mxu1 %v2122_v3  ;;  %v2128_v9 = vld [vmem:[%s2345_s30 + $0x18] sm:$0xff]   ;;  %v2129_v10 = vld [vmem:[%s2345_s30 + $0x60] sm:$0xff]   ;;  %v2132_v13 = vld [vmem:[%s2345_s30 + $0x28] sm:$0xff]  }
  0x25   : > { %1812 = vmatprep.subr.bf16.mxu0 %v2123_v4  ;;  %2095 = vmatprep.subr.bf16.mxu1 %v2123_v4  ;;  %v2130_v11 = vld [vmem:[%s2345_s30 + $0x20] sm:$0xff]   ;;  %v2133_v14 = vld [vmem:[%s2345_s30 + $0x70] sm:$0xff]   ;;  %v2135_v16 = vld [vmem:[%s2345_s30 + $0x78] sm:$0xff]  }
  0x26   : > { %v2134_v15 = vld [vmem:[%s2345_s30 + $0x30] sm:$0xff]   ;;  %v2136_v17 = vld [vmem:[%s2345_s30 + $0x38] sm:$0xff]   ;;  %v2143_v18 = vld [vmem:[%s2345_s30 + $0xc0] sm:$0xff]  }
  0x27   : > { %v2146_v20 = vld [vmem:[%s2345_s30 + $0x100] sm:$0xff]   ;;  %v2145_v24 = vld [vmem:[%s2345_s30 + $0xc8] sm:$0xff]   ;;  %v2154_v29 = vld [vmem:[%s2345_s30 + $0xd0] sm:$0xff]  }
  0x28   : > { %1813 = vmatpush3.bf16.msra.mxu0 %v2124_v5  ;;  %2103 = vmatpush3.bf16.msra.mxu1 %v2124_v5  ;;  %v2140_v21 = vld [vmem:[%s2338_s26 + $0x1e0] ss:$20 sps:$4 sm:$0xff]   ;;  %v2147_v26 = vld [vmem:[%s2345_s30 + $0x88] sm:$0xff]   ;;  %v2156_v31 = vld [vmem:[%s2345_s30 + $0xd8] sm:$0xff]  }
  0x29   : > { %1814 = vmatprep.subr.bf16.mxu0 %v2125_v6  ;;  %2096 = vmatprep.subr.bf16.mxu1 %v2125_v6  ;;  %v2148_v22 = vld [vmem:[%s2338_s26 + $0x2c] ss:$20 sps:$4 sm:$0xff]   ;;  %v2153_v28 = vld [vmem:[%s2338_s26 + $0x208] ss:$20 sps:$4 sm:$0xff]   ;;  %v2155_v30 = vld [vmem:[%s2345_s30 + $0x90] sm:$0xff]  }
  0x2a   : > { %v2144_v23 = vld [vmem:[%s2345_s30 + $0x80] sm:$0xff]   ;;  %v2177_v32 = vld [vmem:[%s2345_s30 + $0x108] sm:$0xff]   ;;  %v2157_v35 = vld [vmem:[%s2345_s30 + $0x98] sm:$0xff]  }
  0x2b   : > { %v2150_v25 = vld [vmem:[%s2338_s26 + $0x20c] ss:$20 sps:$4 sm:$0xff]   ;;  %v2158_v33 = vld [vmem:[%s2338_s26 + $0x54] ss:$20 sps:$4 sm:$0xff]   ;;  %v2162_v36 = vld [vmem:[%s2338_s26 + $0x50] ss:$20 sps:$4 sm:$0xff]  }
  0x2c   : > { %1815 = vmatpush3.bf16.msra.mxu0 %v2126_v7  ;;  %2104 = vmatpush3.bf16.msra.mxu1 %v2126_v7  ;;  %v2160_v34 = vld [vmem:[%s2338_s26 + $0x234] ss:$20 sps:$4 sm:$0xff]   ;;  %v2164_v37 = vld [vmem:[%s2345_s30 + $0xe0] sm:$0xff]   ;;  %v2168_v41 = vld [vmem:[%s2338_s26 + $0x7c] ss:$20 sps:$4 sm:$0xff]  }
  0x2d   : > { %1816 = vmatprep.subr.bf16.mxu0 %v2127_v8  ;;  %2097 = vmatprep.subr.bf16.mxu1 %v2127_v8  ;;  %v2163_v38 = vld [vmem:[%s2338_s26 + $0x230] ss:$20 sps:$4 sm:$0xff]   ;;  %v2166_v40 = vld [vmem:[%s2345_s30 + $0xe8] sm:$0xff]   ;;  %v2176_v50 = vld [vmem:[%s2345_s30 + $0xf8] sm:$0xff]  }
  0x2e   : > { %v2165_v39 = vld [vmem:[%s2345_s30 + $0xa0] sm:$0xff]   ;;  %v2170_v42 = vld [vmem:[%s2338_s26 + $0x25c] ss:$20 sps:$4 sm:$0xff]   ;;  %v2167_v44 = vld [vmem:[%s2345_s30 + $0xa8] sm:$0xff]  }
  0x2f   : > { %v2197_v43 = vld [vmem:[%s2345_s30 + $0x110] sm:$0xff]   ;;  %v2172_v46 = vld [vmem:[%s2338_s26 + $0x78] ss:$20 sps:$4 sm:$0xff]   ;;  %v2181_v54 = vld [vmem:[%s2338_s26 + $0x8] ss:$20 sps:$4 sm:$0xff]  }
  0x30   : > { %1817 = vmatpush3.bf16.msra.mxu0 %v2128_v9  ;;  %2105 = vmatpush3.bf16.msra.mxu1 %v2128_v9  ;;  %v2174_v45 = vld [vmem:[%s2345_s30 + $0xf0] sm:$0xff]   ;;  %v2173_v47 = vld [vmem:[%s2338_s26 + $0x258] ss:$20 sps:$4 sm:$0xff]   ;;  %v2189_v58 = vld [vmem:[%s2338_s26 + $0xc8] ss:$20 sps:$4 sm:$0xff]  }
  0x31   : > { %1818 = vmatprep.subr.bf16.mxu0 %v2129_v10  ;;  %2098 = vmatprep.subr.bf16.mxu1 %v2129_v10  ;;  %v2175_v48 = vld [vmem:[%s2345_s30 + $0xb0] sm:$0xff]   ;;  %v2179_v49 = vld [vmem:[%s2338_s26 + $0xa4] ss:$20 sps:$4 sm:$0xff]   ;;  %v2183_v51 = vld [vmem:[%s2338_s26 + $0xc] ss:$20 sps:$4 sm:$0xff]  }
  0x32   : > { %v2216_v52 = vld [vmem:[%s2345_s30 + $0x118] sm:$0xff]   ;;  %v2184_v55 = vld [vmem:[%s2338_s26 + $0xa0] ss:$20 sps:$4 sm:$0xff]   ;;  %v2190_v59 = vld [vmem:[%s2338_s26 + $0x30] ss:$20 sps:$4 sm:$0xff]  }
  0x33   : > { %v2178_v53 = vld [vmem:[%s2345_s30 + $0xb8] sm:$0xff]   ;;  %v2185_v56 = vld [vmem:[%s2338_s26 + $0xcc] ss:$20 sps:$4 sm:$0xff]   ;;  %v2187_v57 = vld [vmem:[%s2338_s26 + $0x34] ss:$20 sps:$4 sm:$0xff]  }
  0x34   : > { %1819 = vmatpush3.bf16.msra.mxu0 %v2130_v11  ;;  %2106 = vmatpush3.bf16.msra.mxu1 %v2130_v11  ;;  %v2191_v60 = vld [vmem:[%s2338_s26 + $0xf4] ss:$20 sps:$4 sm:$0xff]   ;;  %v2193_v61 = vld [vmem:[%s2338_s26 + $0x5c] ss:$20 sps:$4 sm:$0xff]   ;;  %v2196_v63 = vld [vmem:[%s2338_s26 + $0x58] ss:$20 sps:$4 sm:$0xff]  }
  0x35   : > { %1820 = vmatprep.subr.bf16.mxu0 %v2131_v12  ;;  %2099 = vmatprep.subr.bf16.mxu1 %v2131_v12  ;;  %v2195_v62 = vld [vmem:[%s2338_s26 + $0xf0] ss:$20 sps:$4 sm:$0xff]   ;;  %v2202_v2 = vld [vmem:[%s2338_s26 + $0x118] ss:$20 sps:$4 sm:$0xff]   ;;  %v2203_v3 = vld [vmem:[%s2338_s26 + $0x80] ss:$20 sps:$4 sm:$0xff]  }
  0x36   : > { %v2198_v0 = vld [vmem:[%s2338_s26 + $0x11c] ss:$20 sps:$4 sm:$0xff]   ;;  %v2200_v1 = vld [vmem:[%s2338_s26 + $0x84] ss:$20 sps:$4 sm:$0xff]   ;;  %v2206_v5 = vld [vmem:[%s2338_s26 + $0xac] ss:$20 sps:$4 sm:$0xff]  }
  0x37   : > { %v2204_v4 = vld [vmem:[%s2338_s26 + $0x144] ss:$20 sps:$4 sm:$0xff]   ;;  %v2208_v6 = vld [vmem:[%s2338_s26 + $0x140] ss:$20 sps:$4 sm:$0xff]   ;;  %v2209_v7 = vld [vmem:[%s2338_s26 + $0xa8] ss:$20 sps:$4 sm:$0xff]  }
  0x38   : > { %1821 = vmatpush3.bf16.msra.mxu0 %v2132_v13  ;;  %2107 = vmatpush3.bf16.msra.mxu1 %v2132_v13  ;;  %v2210_v8 = vld [vmem:[%s2338_s26 + $0x16c] ss:$20 sps:$4 sm:$0xff]   ;;  %v2212_v9 = vld [vmem:[%s2338_s26 + $0xd4] ss:$20 sps:$4 sm:$0xff]   ;;  %v2215_v11 = vld [vmem:[%s2338_s26 + $0xd0] ss:$20 sps:$4 sm:$0xff]  }
  0x39   : > { %1822 = vmatprep.subr.bf16.mxu0 %v2133_v14  ;;  %2100 = vmatprep.subr.bf16.mxu1 %v2133_v14  ;;  %v2214_v10 = vld [vmem:[%s2338_s26 + $0x168] ss:$20 sps:$4 sm:$0xff]   ;;  %v2221_v14 = vld [vmem:[%s2338_s26 + $0x190] ss:$20 sps:$4 sm:$0xff]  }
  0x3a   : > { %v2217_v12 = vld [vmem:[%s2338_s26 + $0x194] ss:$20 sps:$4 sm:$0xff]   ;;  %v2219_v13 = vld [vmem:[%s2338_s26 + $0xfc] ss:$20 sps:$4 sm:$0xff]  }
  0x3c   : > { %1823 = vmatpush3.bf16.msra.mxu0 %v2134_v15  ;;  %2108 = vmatpush3.bf16.msra.mxu1 %v2134_v15  ;;  %v2222_v15 = vld [vmem:[%s2338_s26 + $0xf8] ss:$20 sps:$4 sm:$0xff]  }
  0x3d   : > { %1824 = vmatprep.subr.bf16.mxu0 %v2135_v16  ;;  %2101 = vmatprep.subr.bf16.mxu1 %v2135_v16  ;;  %v2223_v16 = vld [vmem:[%s2338_s26 + $0x1bc] ss:$20 sps:$4 sm:$0xff]  }
  0x40   : > { %1825 = vmatpush3.bf16.msra.mxu0 %v2136_v17  ;;  %2109 = vmatpush3.bf16.msra.mxu1 %v2136_v17  ;;  %v2225_v17 = vld [vmem:[%s2338_s26 + $0x124] ss:$20 sps:$4 sm:$0xff]  }
  0x41   : > { %1922 = vmatprep.subr.bf16.mxu1 %v2143_v18  ;;  %2054 = vmatprep.subr.bf16.mxu0 %v2146_v20  ;;  %v2227_v18 = vld [vmem:[%s2338_s26 + $0x1b8] ss:$20 sps:$4 sm:$0xff]  }
  0x43   : > { %1106 = vmatmul.mubr.bf16.vlgmr.msra.gmra.mrb[0].mxu0 %v2137_v19  ;;  %1202 = vmatmul.mubr.bf16.vlgmr.msra.gmra.mrb[0].mxu1 %v2140_v21  ;;  %v2228_v19 = vld [vmem:[%s2338_s26 + $0x120] ss:$20 sps:$4 sm:$0xff]   ;;  %v2231_v21 = vld [vmem:[%s2338_s26 + $0x10] ss:$20 sps:$4 sm:$0xff]  }
  0x44   : > { %1923 = vmatpush3.bf16.msra.mxu1 %v2144_v23  ;;  %2055 = vmatpush3.bf16.msra.mxu0 %v2146_v20  ;;  %v2229_v20 = vld [vmem:[%s2338_s26 + $0x14c] ss:$20 sps:$4 sm:$0xff]  }
  0x45   : > { %1924 = vmatprep.subr.bf16.mxu1 %v2145_v24  ;;  %1113 = vmatprep.mubr.bf16.mxu0 %v2148_v22  ;;  %v2232_v22 = vld [vmem:[%s2338_s26 + $0x148] ss:$20 sps:$4 sm:$0xff]   ;;  %v2233_v23 = vld [vmem:[%s2338_s26 + $0x38] ss:$20 sps:$4 sm:$0xff]  }
  0x46   : > { %1209 = vmatprep.mubr.bf16.mxu1 %v2150_v25  ;;  %2056 = vmatprep.subr.bf16.mxu0 %v2177_v32  ;;  %v2234_v24 = vld [vmem:[%s2338_s26 + $0x174] ss:$20 sps:$4 sm:$0xff]  }
  0x47   : > { %v2236_v25 = vld [vmem:[%s2338_s26 + $0x60] ss:$20 sps:$4 sm:$0xff]  }
  0x48   : > { %1925 = vmatpush3.bf16.msra.mxu1 %v2147_v26  ;;  %2057 = vmatpush3.bf16.msra.mxu0 %v2177_v32  ;;  %v2237_v26 = vld [vmem:[%s2338_s26 + $0x170] ss:$20 sps:$4 sm:$0xff]  }
  0x49   : > { %1926 = vmatprep.subr.bf16.mxu1 %v2154_v29  ;;  %2058 = vmatprep.subr.bf16.mxu0 %v2197_v43  ;;  %v2241_v29 = vld [vmem:[%s2338_s26 + $0xb0] ss:$20 sps:$4 sm:$0xff]  }
  0x4a   : > { %v2244_v32 = vld [vmem:[%s2338_s26 + $0x1c4] ss:$20 sps:$4 sm:$0xff]  }
  0x4b   : > { %1114 = vmatmul.mubr.bf16.gmra.mrb[4].mxu0 %v2152_v27  ;;  %1210 = vmatmul.mubr.bf16.gmra.mrb[4].mxu1 %v2153_v28  ;;  %v2238_v27 = vld [vmem:[%s2338_s26 + $0x88] ss:$20 sps:$4 sm:$0xff]  }
  0x4c   : > { %1927 = vmatpush3.bf16.msra.mxu1 %v2155_v30  ;;  %1121 = vmatprep.mubr.bf16.mxu0 %v2158_v33  ;;  %v2239_v28 = vld [vmem:[%s2338_s26 + $0x19c] ss:$20 sps:$4 sm:$0xff]   ;;  %v2242_v30 = vld [vmem:[%s2338_s26 + $0x198] ss:$20 sps:$4 sm:$0xff]   ;;  %v2246_v33 = vld [vmem:[%s2338_s26 + $0x100] ss:$20 sps:$4 sm:$0xff]  }
  0x4d   : > { %1928 = vmatprep.subr.bf16.mxu1 %v2156_v31  ;;  %1217 = vmatprep.mubr.bf16.mxu1 %v2160_v34  ;;  %v2243_v31 = vld [vmem:[%s2338_s26 + $0xd8] ss:$20 sps:$4 sm:$0xff]   ;;  %v2247_v34 = vld [vmem:[%s2338_s26 + $0x1c0] ss:$20 sps:$4 sm:$0xff]  }
  0x4e   : > { %2059 = vmatpush3.bf16.msra.mxu0 %v2197_v43  ;;  %v2258_v43 = vld [vmem:[%s2338_s26 + $0x1c8] ss:$20 sps:$4 sm:$0xff]  }
  0x4f   : > { %2060 = vmatprep.subr.bf16.mxu0 %v2216_v52 }
  0x50   : > { %1929 = vmatpush3.bf16.msra.mxu1 %v2157_v35  ;;  %v2248_v35 = vld [vmem:[%s2338_s26 + $0x128] ss:$20 sps:$4 sm:$0xff]  }
  0x51   : > { %1930 = vmatprep.subr.bf16.mxu1 %v2164_v37  ;;  %v2251_v37 = vld [vmem:[%s2338_s26 + $0x150] ss:$20 sps:$4 sm:$0xff]  }
  0x52   : > { %2061 = vmatpush3.bf16.msra.mxu0 %v2216_v52 }
  0x53   : > { %1122 = vmatmul.mubr.bf16.gmra.mrb[8].mxu0 %v2162_v36  ;;  %1218 = vmatmul.mubr.bf16.gmra.mrb[8].mxu1 %v2163_v38  ;;  %v2249_v36 = vld [vmem:[%s2338_s26 + $0x1ec] ss:$20 sps:$4 sm:$0xff]   ;;  %v2252_v38 = vld [vmem:[%s2338_s26 + $0x1e8] ss:$20 sps:$4 sm:$0xff]  }
  0x54   : > { %1931 = vmatpush3.bf16.msra.mxu1 %v2165_v39  ;;  %1129 = vmatprep.mubr.bf16.mxu0 %v2168_v41  ;;  %v2253_v39 = vld [vmem:[%s2338_s26 + $0x178] ss:$20 sps:$4 sm:$0xff]   ;;  %v2256_v41 = vld [vmem:[%s2338_s26 + $0x1a0] ss:$20 sps:$4 sm:$0xff]  }
  0x55   : > { %1932 = vmatprep.subr.bf16.mxu1 %v2166_v40  ;;  %1225 = vmatprep.mubr.bf16.mxu1 %v2170_v42  ;;  %v2254_v40 = vld [vmem:[%s2338_s26 + $0x214] ss:$20 sps:$4 sm:$0xff]   ;;  %v2257_v42 = vld [vmem:[%s2338_s26 + $0x210] ss:$20 sps:$4 sm:$0xff]  }
  0x58   : > { %1933 = vmatpush3.bf16.msra.mxu1 %v2167_v44  ;;  %v2259_v44 = vld [vmem:[%s2338_s26 + $0x23c] ss:$20 sps:$4 sm:$0xff]  }
  0x59   : > { %1934 = vmatprep.subr.bf16.mxu1 %v2174_v45  ;;  %v2261_v45 = vld [vmem:[%s2338_s26 + $0x1f0] ss:$20 sps:$4 sm:$0xff]  }
  0x5b   : > { %1130 = vmatmul.mubr.bf16.gmra.mrb[12].mxu0 %v2172_v46  ;;  %1226 = vmatmul.mubr.bf16.gmra.mrb[12].mxu1 %v2173_v47  ;;  %v2262_v46 = vld [vmem:[%s2338_s26 + $0x238] ss:$20 sps:$4 sm:$0xff]  }
  0x5c   : > { %1935 = vmatpush3.bf16.msra.mxu1 %v2175_v48  ;;  %1137 = vmatprep.mubr.bf16.mxu0 %v2179_v49  ;;  %v2263_v47 = vld [vmem:[%s2338_s26 + $0x218] ss:$20 sps:$4 sm:$0xff]   ;;  %v2266_v49 = vld [vmem:[%s2338_s26 + $0x240] ss:$20 sps:$4 sm:$0xff]  }
  0x5d   : > { %1936 = vmatprep.subr.bf16.mxu1 %v2176_v50  ;;  %1266 = vmatprep.mubr.bf16.mxu1 %v2183_v51  ;;  %v2264_v48 = vld [vmem:[%s2338_s26 + $0x264] ss:$20 sps:$4 sm:$0xff]   ;;  %v2267_v50 = vld [vmem:[%s2338_s26 + $0x260] ss:$20 sps:$4 sm:$0xff]   ;;  %v2268_v51 = vld [vmem:[%s2338_s26 + $0x268] ss:$20 sps:$4 sm:$0xff]  }
  0x60   : > { %1937 = vmatpush3.bf16.msra.mxu1 %v2178_v53 }
  0x63   : > { %1138 = vmatmul.mubr.bf16.gmra.mrb[16].mxu0 %v2184_v55  ;;  %1267 = vmatmul.mubr.bf16.vlgmr.msra.gmra.mrb[16].mxu1 %v2181_v54 }
  0x64   : > { %1145 = vmatprep.mubr.bf16.mxu0 %v2185_v56  ;;  %1274 = vmatprep.mubr.bf16.mxu1 %v2187_v57 }
  0x6b   : > { %1146 = vmatmul.mubr.bf16.gmra.mrb[20].mxu0 %v2189_v58  ;;  %1275 = vmatmul.mubr.bf16.gmra.mrb[20].mxu1 %v2190_v59 }
  0x6c   : > { %1153 = vmatprep.mubr.bf16.mxu0 %v2191_v60  ;;  %1282 = vmatprep.mubr.bf16.mxu1 %v2193_v61 }
  0x73   : > { %1154 = vmatmul.mubr.bf16.gmra.mrb[24].mxu0 %v2195_v62  ;;  %1283 = vmatmul.mubr.bf16.gmra.mrb[24].mxu1 %v2196_v63 }
  0x74   : > { %1161 = vmatprep.mubr.bf16.mxu0 %v2198_v0  ;;  %1290 = vmatprep.mubr.bf16.mxu1 %v2200_v1 }
  0x7b   : > { %1162 = vmatmul.mubr.bf16.gmra.mrb[28].mxu0 %v2202_v2  ;;  %1291 = vmatmul.mubr.bf16.gmra.mrb[28].mxu1 %v2203_v3 }
  0x7c   : > { %1169 = vmatprep.mubr.bf16.mxu0 %v2204_v4  ;;  %1298 = vmatprep.mubr.bf16.mxu1 %v2206_v5 }
  0x83   : > { %1170 = vmatmul.mubr.bf16.gmra.mrb[32].mxu0 %v2208_v6  ;;  %1299 = vmatmul.mubr.bf16.gmra.mrb[32].mxu1 %v2209_v7 }
  0x84   : > { %1177 = vmatprep.mubr.bf16.mxu0 %v2210_v8  ;;  %1306 = vmatprep.mubr.bf16.mxu1 %v2212_v9 }
  0x8b   : > { %1178 = vmatmul.mubr.bf16.gmra.mrb[36].mxu0 %v2214_v10  ;;  %1307 = vmatmul.mubr.bf16.gmra.mrb[36].mxu1 %v2215_v11 }
  0x8c   : > { %1185 = vmatprep.mubr.bf16.mxu0 %v2217_v12  ;;  %1314 = vmatprep.mubr.bf16.mxu1 %v2219_v13 }
  0x93   : > { %1186 = vmatmul.mubr.bf16.gmra.mrb[40].mxu0 %v2221_v14  ;;  %1315 = vmatmul.mubr.bf16.gmra.mrb[40].mxu1 %v2222_v15 }
  0x94   : > { %1193 = vmatprep.mubr.bf16.mxu0 %v2223_v16  ;;  %1322 = vmatprep.mubr.bf16.mxu1 %v2225_v17 }
  0x9b   : > { %1194 = vmatmul.mubr.bf16.gmra.mrb[44].mxu0 %v2227_v18  ;;  %1323 = vmatmul.mubr.bf16.gmra.mrb[44].mxu1 %v2228_v19 }
  0x9c   : > { %1330 = vmatprep.mubr.bf16.mxu1 %v2229_v20  ;;  %2062 = vmatprep.mubr.msk.bf16.mxu0 %vm1024_vm0, %v2231_v21 }
  0xa3   : > { %1331 = vmatmul.mubr.bf16.gmra.mrb[48].mxu1 %v2232_v22  ;;  %2063 = vmatmul.mubr.msk.bf16.vlgmr.msra.gmra.mrb[48].mxu0 %vm1024_vm0, %v2233_v23 }
  0xa4   : > { %1338 = vmatprep.mubr.bf16.mxu1 %v2234_v24  ;;  %2066 = vmatprep.mubr.msk.bf16.mxu0 %vm1024_vm0, %v2236_v25 }
  0xab   : > { %1339 = vmatmul.mubr.bf16.gmra.mrb[52].mxu1 %v2237_v26  ;;  %2067 = vmatmul.mubr.msk.bf16.gmra.mrb[52].mxu0 %vm1024_vm0, %v2238_v27 }
  0xac   : > { %1346 = vmatprep.mubr.bf16.mxu1 %v2239_v28  ;;  %2070 = vmatprep.mubr.msk.bf16.mxu0 %vm1024_vm0, %v2241_v29 }
  0xb3   : > { %1347 = vmatmul.mubr.bf16.gmra.mrb[56].mxu1 %v2242_v30  ;;  %2071 = vmatmul.mubr.msk.bf16.gmra.mrb[56].mxu0 %vm1024_vm0, %v2243_v31 }
  0xb4   : > { %1354 = vmatprep.mubr.bf16.mxu1 %v2244_v32  ;;  %2074 = vmatprep.mubr.msk.bf16.mxu0 %vm1024_vm0, %v2246_v33 }
  0xbb   : > { %1355 = vmatmul.mubr.bf16.gmra.mrb[60].mxu1 %v2247_v34  ;;  %2075 = vmatmul.mubr.msk.bf16.gmra.mrb[60].mxu0 %vm1024_vm0, %v2248_v35 }
  0xbc   : > { %1362 = vmatprep.mubr.bf16.mxu1 %v2249_v36  ;;  %2078 = vmatprep.mubr.msk.bf16.mxu0 %vm1024_vm0, %v2251_v37 }
  0xc3   : > { %1363 = vmatmul.mubr.bf16.gmra.mrb[64].mxu1 %v2252_v38  ;;  %2079 = vmatmul.mubr.msk.bf16.gmra.mrb[64].mxu0 %vm1024_vm0, %v2253_v39  ;;  %v2497_v38 = vld [vmem:[%s224_s8] ss:$0 sm:$0xff] }
  0xc4   : > { %1370 = vmatprep.mubr.bf16.mxu1 %v2254_v40  ;;  %2082 = vmatprep.mubr.msk.bf16.mxu0 %vm1024_vm0, %v2256_v41 }
  0xcb   : > { %1371 = vmatmul.mubr.bf16.gmra.mrb[68].mxu1 %v2257_v42  ;;  %2083 = vmatmul.mubr.msk.bf16.gmra.mrb[68].mxu0 %vm1024_vm0, %v2258_v43 }
  0xcc   : > { %1378 = vmatprep.mubr.bf16.mxu1 %v2259_v44  ;;  %2086 = vmatprep.mubr.msk.bf16.mxu0 %vm1024_vm0, %v2261_v45 }
  0xd3   : > { %1379 = vmatmul.mubr.bf16.gmra.mrb[72].mxu1 %v2262_v46  ;;  %2087 = vmatmul.mubr.msk.bf16.gmra.mrb[72].mxu0 %vm1024_vm0, %v2263_v47 }
  0xd4   : > { %1386 = vmatprep.mubr.bf16.mxu1 %v2264_v48  ;;  %2090 = vmatprep.mubr.msk.bf16.mxu0 %vm1024_vm0, %v2266_v49 }
  0xdb   : > { %1387 = vmatmul.mubr.bf16.gmra.mrb[76].mxu1 %v2267_v50  ;;  %2091 = vmatmul.mubr.msk.bf16.gmra.mrb[76].mxu0 %vm1024_vm0, %v2268_v51 }
 0x116   : > { %v1898_v52 = vpop.f32.mrb[0].mxu1  ;;  %v1826_v53 = vpop.f32.mrb[0].mxu0 }
 0x117   : > { %v1899_v54 = vpop.f32.mrb[1].mxu1  ;;  %v1827_v55 = vpop.f32.mrb[1].mxu0 }
 0x118   : > { %v2477_v56 = vadd.f32 %v1899_v54, %v1898_v52  ;;  %v1901_v57 = vpop.f32.mrb[2].mxu1  ;;  %v1828_v58 = vadd.f32 %v1827_v55, %v1826_v53  ;;  %v1829_v59 = vpop.f32.mrb[2].mxu0 }
 0x119   : > { %v1902_v60 = vpop.f32.mrb[3].mxu1  ;;  %v1830_v61 = vpop.f32.mrb[3].mxu0 }
 0x11a   : > { %v2479_v62 = vadd.f32 %v1902_v60, %v1901_v57  ;;  %v1831_v63 = vadd.f32 %v1830_v61, %v1829_v59  ;;  %v1108_v41 = vadd.f32 %v1828_v58, %v2497_v38 }
 0x11c   : > { %v1111_v48 = vadd.f32 %v1831_v63, %v2497_v38 }
 0x11e   : > { %v1904_v0 = vpop.f32.mrb[4].mxu1  ;;  %v1832_v1 = vpop.f32.mrb[4].mxu0 }
 0x11f   : > { %v1905_v2 = vpop.f32.mrb[5].mxu1  ;;  %v1833_v3 = vpop.f32.mrb[5].mxu0 }
 0x120   : > { %v2481_v4 = vadd.f32 %v1905_v2, %v1904_v0  ;;  %v1907_v5 = vpop.f32.mrb[6].mxu1  ;;  %v1834_v6 = vadd.f32 %v1833_v3, %v1832_v1  ;;  %v1835_v7 = vpop.f32.mrb[6].mxu0 }
 0x121   : > { %v1908_v8 = vpop.f32.mrb[7].mxu1  ;;  %v1836_v9 = vpop.f32.mrb[7].mxu0 }
 0x122   : > { %v2483_v10 = vadd.f32 %v1908_v8, %v1907_v5  ;;  %v1837_v11 = vadd.f32 %v1836_v9, %v1835_v7  ;;  %v1116_v58 = vadd.f32 %v1834_v6, %v2497_v38 }
 0x124   : > { %v1119_v63 = vadd.f32 %v1837_v11, %v2497_v38 }
 0x126   : > { %v1910_v12 = vpop.f32.mrb[8].mxu1  ;;  %v1838_v13 = vpop.f32.mrb[8].mxu0 }
 0x127   : > { %v1911_v14 = vpop.f32.mrb[9].mxu1  ;;  %v1839_v15 = vpop.f32.mrb[9].mxu0 }
 0x128   : > { %v2486_v16 = vadd.f32 %v1911_v14, %v1910_v12  ;;  %v1913_v17 = vpop.f32.mrb[10].mxu1  ;;  %v1840_v18 = vadd.f32 %v1839_v15, %v1838_v13  ;;  %v1841_v19 = vpop.f32.mrb[10].mxu0 }
 0x129   : > { %v1914_v20 = vpop.f32.mrb[11].mxu1  ;;  %v1842_v21 = vpop.f32.mrb[11].mxu0 }
 0x12a   : > { %v2488_v22 = vadd.f32 %v1914_v20, %v1913_v17  ;;  %v1843_v23 = vadd.f32 %v1842_v21, %v1841_v19  ;;  %v1124_v6 = vadd.f32 %v1840_v18, %v2497_v38 }
 0x12c   : > { %v1127_v11 = vadd.f32 %v1843_v23, %v2497_v38 }
 0x12e   : > { %v1916_v24 = vpop.f32.mrb[12].mxu1  ;;  %v1844_v25 = vpop.f32.mrb[12].mxu0 }
 0x12f   : > { %v1917_v26 = vpop.f32.mrb[13].mxu1  ;;  %v1845_v27 = vpop.f32.mrb[13].mxu0 }
 0x130   : > { %v2490_v28 = vadd.f32 %v1917_v26, %v1916_v24  ;;  %v1919_v29 = vpop.f32.mrb[14].mxu1  ;;  %v1846_v30 = vadd.f32 %v1845_v27, %v1844_v25  ;;  %v1847_v31 = vpop.f32.mrb[14].mxu0 }
 0x131   : > { %v1920_v32 = vpop.f32.mrb[15].mxu1  ;;  %v1848_v33 = vpop.f32.mrb[15].mxu0 }
 0x132   : > { %v2492_v34 = vadd.f32 %v1920_v32, %v1919_v29  ;;  %v1849_v35 = vadd.f32 %v1848_v33, %v1847_v31  ;;  %v1132_v18 = vadd.f32 %v1846_v30, %v2497_v38 }
 0x134   : > { %v1135_v23 = vadd.f32 %v1849_v35, %v2497_v38 }
 0x136   : > { %v1938_v36 = vpop.f32.mrb[16].mxu1  ;;  %v1850_v37 = vpop.f32.mrb[16].mxu0 }
 0x137   : > { %v1939_v39 = vpop.f32.mrb[17].mxu1  ;;  %v1851_v40 = vpop.f32.mrb[17].mxu0 }
 0x138   : > { %v1940_v42 = vadd.f32 %v1939_v39, %v1938_v36  ;;  %v1941_v43 = vpop.f32.mrb[18].mxu1  ;;  %v1852_v44 = vadd.f32 %v1851_v40, %v1850_v37  ;;  %v1853_v45 = vpop.f32.mrb[18].mxu0 }
 0x139   : > { %v1942_v46 = vpop.f32.mrb[19].mxu1  ;;  %v1854_v47 = vpop.f32.mrb[19].mxu0 }
 0x13a   : > { %v1943_v49 = vadd.f32 %v1942_v46, %v1941_v43  ;;  %v1855_v50 = vadd.f32 %v1854_v47, %v1853_v45  ;;  %v2501_v51 = vadd.f32 %v1940_v42, %v1108_v41  ;;  %v1140_v30 = vadd.f32 %v1852_v44, %v2497_v38 }
 0x13c   : > { %v2503_v52 = vadd.f32 %v1943_v49, %v1111_v48  ;;  %v1143_v35 = vadd.f32 %v1855_v50, %v2497_v38 }
 0x13e   : > { %v1944_v53 = vpop.f32.mrb[20].mxu1  ;;  %v1856_v54 = vpop.f32.mrb[20].mxu0 }
 0x13f   : > { %v1945_v55 = vpop.f32.mrb[21].mxu1  ;;  %v1857_v57 = vpop.f32.mrb[21].mxu0 }
 0x140   : > { %v1946_v59 = vadd.f32 %v1945_v55, %v1944_v53  ;;  %v1947_v60 = vpop.f32.mrb[22].mxu1  ;;  %v1858_v61 = vadd.f32 %v1857_v57, %v1856_v54  ;;  %v1859_v0 = vpop.f32.mrb[22].mxu0 }
 0x141   : > { %v1948_v1 = vpop.f32.mrb[23].mxu1  ;;  %v1860_v2 = vpop.f32.mrb[23].mxu0 }
 0x142   : > { %v1949_v3 = vadd.f32 %v1948_v1, %v1947_v60  ;;  %v1861_v5 = vadd.f32 %v1860_v2, %v1859_v0  ;;  %v2507_v7 = vadd.f32 %v1946_v59, %v1116_v58 }
 0x144   : > { %v2509_v8 = vadd.f32 %v1949_v3, %v1119_v63 }
 0x146   : > { %v1950_v9 = vpop.f32.mrb[24].mxu1  ;;  %v1862_v12 = vpop.f32.mrb[24].mxu0 }
 0x147   : > { %v1951_v13 = vpop.f32.mrb[25].mxu1  ;;  %v1863_v14 = vpop.f32.mrb[25].mxu0 }
 0x148   : > { %v1952_v15 = vadd.f32 %v1951_v13, %v1950_v9  ;;  %v1953_v17 = vpop.f32.mrb[26].mxu1  ;;  %v1864_v19 = vadd.f32 %v1863_v14, %v1862_v12  ;;  %v1865_v20 = vpop.f32.mrb[26].mxu0 }
 0x149   : > { %v1954_v21 = vpop.f32.mrb[27].mxu1  ;;  %v1866_v24 = vpop.f32.mrb[27].mxu0 }
 0x14a   : > { %v1955_v25 = vadd.f32 %v1954_v21, %v1953_v17  ;;  %v1867_v26 = vadd.f32 %v1866_v24, %v1865_v20  ;;  %v2513_v27 = vadd.f32 %v1952_v15, %v1124_v6  ;;  %v1148_v6 = vadd.f32 %v1858_v61, %v2497_v38 }
 0x14c   : > { %v2515_v29 = vadd.f32 %v1955_v25, %v1127_v11  ;;  %v1151_v11 = vadd.f32 %v1861_v5, %v2497_v38 }
 0x14e   : > { %v1956_v31 = vpop.f32.mrb[28].mxu1  ;;  %v1868_v32 = vpop.f32.mrb[28].mxu0 }
 0x14f   : > { %v1957_v33 = vpop.f32.mrb[29].mxu1  ;;  %v1869_v36 = vpop.f32.mrb[29].mxu0 }
 0x150   : > { %v1958_v37 = vadd.f32 %v1957_v33, %v1956_v31  ;;  %v1959_v39 = vpop.f32.mrb[30].mxu1  ;;  %v1870_v40 = vadd.f32 %v1869_v36, %v1868_v32  ;;  %v1871_v41 = vpop.f32.mrb[30].mxu0 }
 0x151   : > { %v1960_v42 = vpop.f32.mrb[31].mxu1  ;;  %v1872_v43 = vpop.f32.mrb[31].mxu0 }
 0x152   : > { %v1961_v45 = vadd.f32 %v1960_v42, %v1959_v39  ;;  %v1873_v46 = vadd.f32 %v1872_v43, %v1871_v41  ;;  %v2519_v47 = vadd.f32 %v1958_v37, %v1132_v18  ;;  %v1156_v39 = vadd.f32 %v1864_v19, %v2497_v38 }
 0x154   : > { %v2521_v48 = vadd.f32 %v1961_v45, %v1135_v23 }
 0x156   : > { %v1962_v49 = vpop.f32.mrb[32].mxu1  ;;  %v1874_v53 = vpop.f32.mrb[32].mxu0 }
 0x157   : > { %v1963_v54 = vpop.f32.mrb[33].mxu1  ;;  %v1875_v55 = vpop.f32.mrb[33].mxu0 }
 0x158   : > { %v1964_v57 = vadd.f32 %v1963_v54, %v1962_v49  ;;  %v1965_v58 = vpop.f32.mrb[34].mxu1  ;;  %v2524_v59 = vadd.f32 %v1875_v55, %v1874_v53  ;;  %v1877_v60 = vpop.f32.mrb[34].mxu0  ;;  %v1159_v49 = vadd.f32 %v1867_v26, %v2497_v38 }
 0x159   : > { %v1966_v0 = vpop.f32.mrb[35].mxu1  ;;  %v1878_v1 = vpop.f32.mrb[35].mxu0 }
 0x15a   : > { %v1967_v2 = vadd.f32 %v1966_v0, %v1965_v58  ;;  %v2527_v63 = vadd.f32 %v1878_v1, %v1877_v60  ;;  %v2529_v3 = vadd.f32 %v1964_v57, %v1140_v30  ;;  %v1164_v0 = vadd.f32 %v1870_v40, %v2497_v38 }
 0x15c   : > { %v2531_v9 = vadd.f32 %v1967_v2, %v1143_v35 }
 0x15e   : > { %v1968_v12 = vpop.f32.mrb[36].mxu1  ;;  %v1880_v13 = vpop.f32.mrb[36].mxu0 }
 0x15f   : > { %v1969_v14 = vpop.f32.mrb[37].mxu1  ;;  %v1881_v44 = vpop.f32.mrb[37].mxu0 }
 0x160   : > { %v1970_v15 = vadd.f32 %v1969_v14, %v1968_v12  ;;  %v1971_v17 = vpop.f32.mrb[38].mxu1  ;;  %v2534_v20 = vadd.f32 %v1881_v44, %v1880_v13  ;;  %v1883_v21 = vpop.f32.mrb[38].mxu0  ;;  %v1167_v14 = vadd.f32 %v1873_v46, %v2497_v38 }
 0x161   : > { %v1972_v24 = vpop.f32.mrb[39].mxu1  ;;  %v1884_v50 = vpop.f32.mrb[39].mxu0 }
 0x162   : > { %v1973_v25 = vadd.f32 %v1972_v24, %v1971_v17  ;;  %v2537_v31 = vadd.f32 %v1884_v50, %v1883_v21  ;;  %v2539_v32 = vadd.f32 %v1970_v15, %v1148_v6 }
 0x164   : > { %v2541_v33 = vadd.f32 %v1973_v25, %v1151_v11  ;;  %v1172_v11 = vadd.f32 %v2524_v59, %v2497_v38 }
 0x166   : > { %v1974_v36 = vpop.f32.mrb[40].mxu1  ;;  %v1886_v18 = vpop.f32.mrb[40].mxu0 }
 0x167   : > { %v1975_v37 = vpop.f32.mrb[41].mxu1  ;;  %v1887_v61 = vpop.f32.mrb[41].mxu0 }
 0x168   : > { %v1976_v41 = vadd.f32 %v1975_v37, %v1974_v36  ;;  %v1977_v42 = vpop.f32.mrb[42].mxu1  ;;  %v2544_v43 = vadd.f32 %v1887_v61, %v1886_v18  ;;  %v1889_v23 = vpop.f32.mrb[42].mxu0 }
 0x169   : > { %v1978_v45 = vpop.f32.mrb[43].mxu1  ;;  %v1890_v5 = vpop.f32.mrb[43].mxu0 }
 0x16a   : > { %v1979_v53 = vadd.f32 %v1978_v45, %v1977_v42  ;;  %v2547_v54 = vadd.f32 %v1890_v5, %v1889_v23  ;;  %v2549_v55 = vadd.f32 %v1976_v41, %v1156_v39 }
 0x16c   : > { %v2551_v30 = vadd.f32 %v1979_v53, %v1159_v49 }
 0x16e   : > { %v1980_v57 = vpop.f32.mrb[44].mxu1  ;;  %v1892_v58 = vpop.f32.mrb[44].mxu0 }
 0x16f   : > { %v1981_v19 = vpop.f32.mrb[45].mxu1  ;;  %v1893_v60 = vpop.f32.mrb[45].mxu0 }
 0x170   : > { %v1982_v1 = vadd.f32 %v1981_v19, %v1980_v57  ;;  %v1983_v35 = vpop.f32.mrb[46].mxu1  ;;  %v2554_v2 = vadd.f32 %v1893_v60, %v1892_v58  ;;  %v1895_v12 = vpop.f32.mrb[46].mxu0 }
 0x171   : > { %v1984_v26 = vpop.f32.mrb[47].mxu1  ;;  %v1896_v13 = vpop.f32.mrb[47].mxu0 }
 0x172   : > { %v1985_v44 = vadd.f32 %v1984_v26, %v1983_v35  ;;  %v2557_v6 = vadd.f32 %v1896_v13, %v1895_v12  ;;  %v2559_v15 = vadd.f32 %v1982_v1, %v1164_v0 }
 0x174   : > { %v2562_v17 = vadd.f32 %v1985_v44, %v1167_v14 }
 0x176   : > { %v1986_v21 = vpop.f32.mrb[48].mxu1  ;;  %v2064_v40 = vpop.f32.mrb[48].mxu0 }
 0x177   : > { %v1438_v24 = vadd.f32 %v2064_v40, %v2507_v7  ;;  %v1987_v46 = vpop.f32.mrb[49].mxu1  ;;  %v1429_v50 = vpop.f32.mrb[49].mxu0  ;;  %v1175_v7 = vadd.f32 %v2527_v63, %v2497_v38  ;;  %v1180_v63 = vadd.f32 %v2534_v20, %v2497_v38 }
 0x178   : > { %v1988_v25 = vadd.f32 %v1987_v46, %v1986_v21  ;;  %v1430_v36 = vadd.f32 %v1429_v50, %v2501_v51  ;;  %v1989_v18 = vpop.f32.mrb[50].mxu1  ;;  %v2065_v37 = vpop.f32.mrb[50].mxu0 }
 0x179   : > { %1558 = vst [vmem:[%s2567_s12 + $0x10] sm:$0xff] %v1438_v24  ;;  %v1441_v61 = vadd.f32 %v2065_v37, %v2509_v8  ;;  %v1990_v39 = vpop.f32.mrb[51].mxu1  ;;  %v1432_v41 = vpop.f32.mrb[51].mxu0 }
 0x17a   : > { %1556 = vst [vmem:[%s2567_s12] sm:$0xff] %v1430_v36  ;;  %v1991_v42 = vadd.f32 %v1990_v39, %v1989_v18  ;;  %v1433_v23 = vadd.f32 %v1432_v41, %v2503_v52  ;;  %v2579_v45 = vadd.f32 %v1988_v25, %v1172_v11 }
 0x17b   : > { %1559 = vst [vmem:[%s2567_s12 + $0x18] sm:$0xff] %v1441_v61 }
 0x17c   : > { %1557 = vst [vmem:[%s2567_s12 + $0x8] sm:$0xff] %v1433_v23  ;;  %v2583_v51 = vadd.f32 %v1991_v42, %v1175_v7 }
 0x17e   : > { %v1992_v59 = vpop.f32.mrb[52].mxu1  ;;  %v2068_v5 = vpop.f32.mrb[52].mxu0 }
 0x17f   : > { %v1454_v8 = vadd.f32 %v2068_v5, %v2519_v47  ;;  %v1993_v49 = vpop.f32.mrb[53].mxu1  ;;  %v1445_v53 = vpop.f32.mrb[53].mxu0  ;;  %v1183_v47 = vadd.f32 %v2537_v31, %v2497_v38  ;;  %v1188_v31 = vadd.f32 %v2544_v43, %v2497_v38 }
 0x180   : > { %v1994_v57 = vadd.f32 %v1993_v49, %v1992_v59  ;;  %v1446_v52 = vadd.f32 %v1445_v53, %v2513_v27  ;;  %v1995_v58 = vpop.f32.mrb[54].mxu1  ;;  %v2069_v19 = vpop.f32.mrb[54].mxu0 }
 0x181   : > { %1562 = vst [vmem:[%s2567_s12 + $0x30] sm:$0xff] %v1454_v8  ;;  %v1457_v60 = vadd.f32 %v2069_v19, %v2521_v48  ;;  %v1996_v0 = vpop.f32.mrb[55].mxu1  ;;  %v1448_v1 = vpop.f32.mrb[55].mxu0 }
 0x182   : > { %1560 = vst [vmem:[%s2567_s12 + $0x20] sm:$0xff] %v1446_v52  ;;  %v1997_v35 = vadd.f32 %v1996_v0, %v1995_v58  ;;  %v1449_v12 = vadd.f32 %v1448_v1, %v2515_v29  ;;  %v1341_v26 = vadd.f32 %v1994_v57, %v1180_v63 }
 0x183   : > { %1563 = vst [vmem:[%s2567_s12 + $0x38] sm:$0xff] %v1457_v60 }
 0x184   : > { %1561 = vst [vmem:[%s2567_s12 + $0x28] sm:$0xff] %v1449_v12  ;;  %v1344_v20 = vadd.f32 %v1997_v35, %v1183_v47  ;;  %v1207_v35 = vadd.f32 %v2479_v62, %v2497_v38  ;;  %v1212_v62 = vadd.f32 %v2481_v4, %v2497_v38 }
 0x186   : > { %v1998_v27 = vpop.f32.mrb[56].mxu1  ;;  %v2072_v13 = vpop.f32.mrb[56].mxu0 }
 0x187   : > { %v1470_v14 = vadd.f32 %v2072_v13, %v2539_v32  ;;  %v1999_v48 = vpop.f32.mrb[57].mxu1  ;;  %v1461_v44 = vpop.f32.mrb[57].mxu0  ;;  %v1191_v32 = vadd.f32 %v2547_v54, %v2497_v38  ;;  %v1196_v54 = vadd.f32 %v2554_v2, %v2497_v38 }
 0x188   : > { %v2000_v21 = vadd.f32 %v1999_v48, %v1998_v27  ;;  %v1462_v40 = vadd.f32 %v1461_v44, %v2529_v3  ;;  %v2001_v29 = vpop.f32.mrb[58].mxu1  ;;  %v2073_v24 = vpop.f32.mrb[58].mxu0 }
 0x189   : > { %1566 = vst [vmem:[%s2567_s12 + $0x50] sm:$0xff] %v1470_v14  ;;  %v1473_v46 = vadd.f32 %v2073_v24, %v2541_v33  ;;  %v2002_v50 = vpop.f32.mrb[59].mxu1  ;;  %v1464_v11 = vpop.f32.mrb[59].mxu0 }
 0x18a   : > { %1564 = vst [vmem:[%s2567_s12 + $0x40] sm:$0xff] %v1462_v40  ;;  %v2003_v25 = vadd.f32 %v2002_v50, %v2001_v29  ;;  %v1465_v36 = vadd.f32 %v1464_v11, %v2531_v9  ;;  %v1349_v18 = vadd.f32 %v2000_v21, %v1188_v31 }
 0x18b   : > { %1567 = vst [vmem:[%s2567_s12 + $0x58] sm:$0xff] %v1473_v46  ;;  %v1215_v46 = vadd.f32 %v2483_v10, %v2497_v38 }
 0x18c   : > { %1565 = vst [vmem:[%s2567_s12 + $0x48] sm:$0xff] %v1465_v36  ;;  %v1352_v43 = vadd.f32 %v2003_v25, %v1191_v32 }
 0x18e   : > { %v2004_v3 = vpop.f32.mrb[60].mxu1  ;;  %v2076_v37 = vpop.f32.mrb[60].mxu0 }
 0x18f   : > { %v1486_v61 = vadd.f32 %v2076_v37, %v2559_v15  ;;  %v2005_v33 = vpop.f32.mrb[61].mxu1  ;;  %v1477_v39 = vpop.f32.mrb[61].mxu0  ;;  %v1199_v15 = vadd.f32 %v2557_v6, %v2497_v38  ;;  %v1204_v6 = vadd.f32 %v2477_v56, %v2497_v38 }
 0x190   : > { %v2006_v41 = vadd.f32 %v2005_v33, %v2004_v3  ;;  %v1478_v7 = vadd.f32 %v1477_v39, %v2549_v55  ;;  %v2007_v9 = vpop.f32.mrb[62].mxu1  ;;  %v2077_v42 = vpop.f32.mrb[62].mxu0 }
 0x191   : > { %1570 = vst [vmem:[%s2567_s12 + $0x70] sm:$0xff] %v1486_v61  ;;  %v1489_v23 = vadd.f32 %v2077_v42, %v2562_v17  ;;  %v2008_v59 = vpop.f32.mrb[63].mxu1  ;;  %v1480_v5 = vpop.f32.mrb[63].mxu0  ;;  %v1220_v61 = vadd.f32 %v2486_v16, %v2497_v38 }
 0x192   : > { %1568 = vst [vmem:[%s2567_s12 + $0x60] sm:$0xff] %v1478_v7  ;;  %v2009_v8 = vadd.f32 %v2008_v59, %v2007_v9  ;;  %v1481_v49 = vadd.f32 %v1480_v5, %v2551_v30  ;;  %v1357_v53 = vadd.f32 %v2006_v41, %v1196_v54  ;;  %v1223_v9 = vadd.f32 %v2488_v22, %v2497_v38 }
 0x193   : > { %1571 = vst [vmem:[%s2567_s12 + $0x78] sm:$0xff] %v1489_v23 }
 0x194   : > { %1569 = vst [vmem:[%s2567_s12 + $0x68] sm:$0xff] %v1481_v49  ;;  %v1360_v2 = vadd.f32 %v2009_v8, %v1199_v15 }
 0x196   : > { %v2010_v55 = vpop.f32.mrb[64].mxu1  ;;  %v2080_v63 = vpop.f32.mrb[64].mxu0 }
 0x197   : > { %v1502_v57 = vadd.f32 %v2080_v63, %v1341_v26  ;;  %v2011_v52 = vpop.f32.mrb[65].mxu1  ;;  %v1493_v17 = vpop.f32.mrb[65].mxu0 }
 0x198   : > { %v2012_v58 = vadd.f32 %v2011_v52, %v2010_v55  ;;  %v1494_v19 = vadd.f32 %v1493_v17, %v2579_v45  ;;  %v2013_v60 = vpop.f32.mrb[66].mxu1  ;;  %v2081_v30 = vpop.f32.mrb[66].mxu0  ;;  %v1231_v17 = vadd.f32 %v2492_v34, %v2497_v38 }
 0x199   : > { %1574 = vst [vmem:[%s2567_s12 + $0x90] sm:$0xff] %v1502_v57  ;;  %v1505_v0 = vadd.f32 %v2081_v30, %v1344_v20  ;;  %v2014_v1 = vpop.f32.mrb[67].mxu1  ;;  %v1496_v47 = vpop.f32.mrb[67].mxu0 }
 0x19a   : > { %1572 = vst [vmem:[%s2567_s12 + $0x80] sm:$0xff] %v1494_v19  ;;  %v2015_v12 = vadd.f32 %v2014_v1, %v2013_v60  ;;  %v1497_v26 = vadd.f32 %v1496_v47, %v2583_v51  ;;  %v1365_v27 = vadd.f32 %v2012_v58, %v1204_v6 }
 0x19b   : > { %1575 = vst [vmem:[%s2567_s12 + $0x98] sm:$0xff] %v1505_v0 }
 0x19c   : > { %1573 = vst [vmem:[%s2567_s12 + $0x88] sm:$0xff] %v1497_v26  ;;  %v1368_v56 = vadd.f32 %v2015_v12, %v1207_v35 }
 0x19e   : > { %v2016_v45 = vpop.f32.mrb[68].mxu1  ;;  %v2084_v13 = vpop.f32.mrb[68].mxu0 }
 0x19f   : > { %v1518_v14 = vadd.f32 %v2084_v13, %v1357_v53  ;;  %v2017_v48 = vpop.f32.mrb[69].mxu1  ;;  %v1509_v20 = vpop.f32.mrb[69].mxu0  ;;  %v1228_v53 = vadd.f32 %v2490_v28, %v2497_v38 }
 0x1a0   : > { %v2018_v44 = vadd.f32 %v2017_v48, %v2016_v45  ;;  %v1510_v31 = vadd.f32 %v1509_v20, %v1349_v18  ;;  %v2019_v21 = vpop.f32.mrb[70].mxu1  ;;  %v2085_v40 = vpop.f32.mrb[70].mxu0 }
 0x1a1   : > { %1578 = vst [vmem:[%s2567_s12 + $0xb0] sm:$0xff] %v1518_v14  ;;  %v1521_v51 = vadd.f32 %v2085_v40, %v1360_v2  ;;  %v2020_v29 = vpop.f32.mrb[71].mxu1  ;;  %v1512_v24 = vpop.f32.mrb[71].mxu0 }
 0x1a2   : > { %1576 = vst [vmem:[%s2567_s12 + $0xa0] sm:$0xff] %v1510_v31  ;;  %v2021_v50 = vadd.f32 %v2020_v29, %v2019_v21  ;;  %v1513_v11 = vadd.f32 %v1512_v24, %v1352_v43  ;;  %v1373_v32 = vadd.f32 %v2018_v44, %v1212_v62 }
 0x1a3   : > { %1579 = vst [vmem:[%s2567_s12 + $0xb8] sm:$0xff] %v1521_v51 }
 0x1a4   : > { %1577 = vst [vmem:[%s2567_s12 + $0xa8] sm:$0xff] %v1513_v11  ;;  %v1376_v25 = vadd.f32 %v2021_v50, %v1215_v46 }
 0x1a6   : > { %v2022_v4 = vpop.f32.mrb[72].mxu1  ;;  %v2088_v36 = vpop.f32.mrb[72].mxu0 }
 0x1a7   : > { %v1534_v18 = vadd.f32 %v2088_v36, %v1373_v32  ;;  %v2023_v3 = vpop.f32.mrb[73].mxu1  ;;  %v1525_v37 = vpop.f32.mrb[73].mxu0 }
 0x1a8   : > { %v2024_v10 = vadd.f32 %v2023_v3, %v2022_v4  ;;  %v1526_v33 = vadd.f32 %v1525_v37, %v1365_v27  ;;  %v2025_v39 = vpop.f32.mrb[74].mxu1  ;;  %v2089_v54 = vpop.f32.mrb[74].mxu0 }
 0x1a9   : > { %1582 = vst [vmem:[%s2567_s12 + $0xd0] sm:$0xff] %v1534_v18  ;;  %v1537_v43 = vadd.f32 %v2089_v54, %v1376_v25  ;;  %v2026_v41 = vpop.f32.mrb[75].mxu1  ;;  %v1528_v7 = vpop.f32.mrb[75].mxu0 }
 0x1aa   : > { %1580 = vst [vmem:[%s2567_s12 + $0xc0] sm:$0xff] %v1526_v33  ;;  %v2027_v42 = vadd.f32 %v2026_v41, %v2025_v39  ;;  %v1529_v23 = vadd.f32 %v1528_v7, %v1368_v56  ;;  %v1381_v59 = vadd.f32 %v2024_v10, %v1220_v61 }
 0x1ab   : > { %1583 = vst [vmem:[%s2567_s12 + $0xd8] sm:$0xff] %v1537_v43 }
 0x1ac   : > { %1581 = vst [vmem:[%s2567_s12 + $0xc8] sm:$0xff] %v1529_v23  ;;  %v1384_v5 = vadd.f32 %v2027_v42, %v1223_v9 }
 0x1ae   : > { %v2028_v16 = vpop.f32.mrb[76].mxu1  ;;  %v2092_v15 = vpop.f32.mrb[76].mxu0 }
 0x1af   : > { %v2029_v8 = vpop.f32.mrb[77].mxu1  ;;  %v1541_v49 = vpop.f32.mrb[77].mxu0 }
 0x1b0   : > { %v2030_v2 = vadd.f32 %v2029_v8, %v2028_v16  ;;  %v1542_v22 = vadd.f32 %v1541_v49, %v1381_v59  ;;  %v2031_v55 = vpop.f32.mrb[78].mxu1  ;;  %v2093_v63 = vpop.f32.mrb[78].mxu0 }
 0x1b1   : > { %v2032_v57 = vpop.f32.mrb[79].mxu1  ;;  %v1544_v52 = vpop.f32.mrb[79].mxu0 }
 0x1b2   : > { %v1389_v6 = vadd.f32 %v2030_v2, %v1228_v53  ;;  %1584 = vst [vmem:[%s2567_s12 + $0xe0] sm:$0xff] %v1542_v22  ;;  %v2033_v58 = vadd.f32 %v2032_v57, %v2031_v55  ;;  %v1545_v19 = vadd.f32 %v1544_v52, %v1384_v5 }
 0x1b4   : > { %v1550_v60 = vadd.f32 %v2092_v15, %v1389_v6  ;;  %v1392_v30 = vadd.f32 %v2033_v58, %v1231_v17  ;;  %1585 = vst [vmem:[%s2567_s12 + $0xe8] sm:$0xff] %v1545_v19 }
 0x1b6   : > { %1586 = vst [vmem:[%s2567_s12 + $0xf0] sm:$0xff] %v1550_v60  ;;  %v1553_v0 = vadd.f32 %v2093_v63, %v1392_v30 }
 0x1b8   : > { %1587 = vst [vmem:[%s2567_s12 + $0xf8] sm:$0xff] %v1553_v0 }
 0x1b9 PF: > { %s20_s20 = sadd.s32 1, %s2289_s20  }
 0x1ba   : > { %p17_p11 = scmp.ge.s32.totalorder %s20_s20, 5  }
 0x1bc   :  { %19 = sbr.rel (!%p17_p11) target bundleno = 16 (0x10), region = 68 }

// kernel: a_call__.5
= control target key start
LH: loop header
LB: loop body
LE: loop exit
PB: predicated region body
PF: predicated region fallthrough
CT: control target
= control target key end

     0   :  { %s727_s0 = inlined_call_operand.vmem [shape: s32[3], index: 0, kind: input, shape index: {}]   ;;  %s728_s1 = inlined_call_operand.vmem [shape: bf16[192,144], index: 1, kind: input, shape index: {}]   ;;  %s729_s2 = inlined_call_operand.vmem [shape: bf16[3,144,128], index: 2, kind: input, shape index: {}]   ;;  %s730_s3 = inlined_call_operand.vmem [shape: f32[3,1,128], index: 3, kind: input, shape index: {}]   ;;  %s731_s4 = inlined_call_operand.vmem [shape: f32[192,128], index: 4, kind: output, shape index: {}]  }
   0x1   :  { %s9_s17 = sshll.u32 %s727_s0, 4  ;;  %s10_s17 = int_to_ptr.vmem [resolvable:$true] %s9_s17 }
   0x2   :  { %s605_s18 = scalar_lea.vmem %s10_s17, 16  ;;  %p610_p1 = scmp.lt.s32.totalorder %s10_s17, %s10_s17 }
   0x3   :  { %p606_p0 = scmp.ne.s32.totalorder %s10_s17, %s605_s18  ;;  %p611_p2 = scmp.lt.s32.totalorder %s605_s18, %s605_s18 }
   0x5   :  { %p612_p3 = por %p611_p2, %p610_p1 }
   0x7   :  { %p613_p4 = pnand %p612_p3, %p606_p0 }
   0x9   :  { %616 = shalt.err (!%p613_p4)  }
   0xa   :  { %s627_s19 = smov [#allocation3]  }
   0xb   :  { %12 = dma.vmem_to_smem %s10_s17, 16, %s627_s19, [#allocation2] }
   0xc   :  { %621 = dma.done.wait [#allocation2], 16 }
   0xd   :  { %622 = vsyncadd [#allocation2], 4294967280 }
   0xe   :  { %14 = sfence }
   0xf   :  { %s657_s20 = smov 0  }
  0x10 LB: > { %s663_s0 = sadd.s32 4294967295, %s625_s20   ;;  %p523_p5 = scmp.ge.s32.totalorder %s625_s20, 1  ;;  %s625_s20 = sphi %s657_s20, %s20_s20  }
  0x11   : > { %p172_p6 = scmp.lt.s32.totalorder %s625_s20, 4 }
  0x13   : > { %p173_p7 = pnand %p523_p5, %p172_p6 }
  0x14   : > { %s214_s21 = sld [smem:[#allocation3 + %s663_s0]] (!%p173_p7)  ;;  %s524_s22 = sshll.u32 (!%p173_p7), %s663_s0, 3  ;;  %v628_v0 = vmov (!%p173_p7), 0   ;;  %vm356_vm0 = vcmask (!%p173_p7), 130048  }
  0x15   : > { %176 = sbr.rel (%p173_p7) target bundleno = 294 (0x126), region = 32  ;;  %369 = vmatprep.subr.bf16.mxu0 (!%p173_p7), %v628_v0  ;;  %555 = vmatprep.subr.bf16.mxu1 (!%p173_p7), %v628_v0  ;;  %p208_p8 = scmp.lt.s32.totalorder (!%p173_p7), %s524_s22, 23 }
  0x16   : > { %s221_s5 = sld [smem:[#allocation3 + %s663_s0]] (!%p173_p7) }
  0x1a   : > { %p215_p9 = scmp.lt.s32.totalorder (!%p173_p7), %s214_s21, 2 }
  0x1c   : > { %s733_s22 = smov (!%p208_p8, %s524_s22), 23  ;;  %s735_s21 = smov (!%p215_p9, %s214_s21), 2 }
  0x1d   : > { %s554_s23 = sshll.u32 %s733_s22, 3  ;;  %s573_s27 = smul.u32 72, %s735_s21 }
  0x1e   : > { %s677_s26 = scalar_lea.vmem %s728_s1, %s554_s23  ;;  %p222_p10 = scmp.lt.s32.totalorder %s221_s5, 2 }
  0x1f   : > { %v595_v1 = vld [vmem:[%s677_s26 + $0x4] ss:$8 sps:$4 sm:$0xff]   ;;  %s686_s30 = scalar_lea.vmem %s729_s2, %s573_s27  ;;  %v593_v12 = vld [vmem:[%s677_s26] ss:$8 sps:$4 sm:$0xff]   ;;  %v599_v14 = vld [vmem:[%s677_s26 + $0x14] ss:$8 sps:$4 sm:$0xff]   ;;  %s714_s11 = scalar_lea.vmem %s731_s4, %s554_s23 }
  0x20   : > { %v598_v2 = vld [vmem:[%s677_s26 + $0x24] ss:$8 sps:$4 sm:$0xff]   ;;  %548 = vmatprep.mubr.msk.bf16.mxu0 %vm356_vm0, %v595_v1  ;;  %v586_v5 = vld [vmem:[%s686_s30 + $0x10] sm:$0xff]   ;;  %v587_v6 = vld [vmem:[%s686_s30 + $0x18] sm:$0xff]   ;;  %s737_s5 = smov (!%p222_p10, %s221_s5), 2 }
  0x21   : > { %550 = vmatprep.mubr.msk.bf16.mxu1 %vm356_vm0, %v598_v2  ;;  %v584_v3 = vld [vmem:[%s686_s30] sm:$0xff]   ;;  %v585_v4 = vld [vmem:[%s686_s30 + $0x8] sm:$0xff]   ;;  %v590_v9 = vld [vmem:[%s686_s30 + $0x30] sm:$0xff]   ;;  %s224_s8 = scalar_lea.vmem %s730_s3, %s737_s5 }
  0x22   : > { %370 = vmatpush1.bf16.msra.mxu0 %v584_v3  ;;  %564 = vmatpush1.bf16.msra.mxu1 %v584_v3  ;;  %v588_v7 = vld [vmem:[%s686_s30 + $0x20] sm:$0xff]   ;;  %v589_v8 = vld [vmem:[%s686_s30 + $0x28] sm:$0xff]   ;;  %v591_v10 = vld [vmem:[%s686_s30 + $0x38] sm:$0xff]  }
  0x23   : > { %371 = vmatprep.subr.bf16.mxu0 %v628_v0  ;;  %556 = vmatprep.subr.bf16.mxu1 %v628_v0  ;;  %v592_v11 = vld [vmem:[%s686_s30 + $0x40] sm:$0xff]   ;;  %v601_v15 = vld [vmem:[%s677_s26 + $0x34] ss:$8 sps:$4 sm:$0xff]   ;;  %v603_v16 = vld [vmem:[%s677_s26 + $0x10] ss:$8 sps:$4 sm:$0xff]  }
  0x24   : > { %v596_v13 = vld [vmem:[%s677_s26 + $0x20] ss:$8 sps:$4 sm:$0xff]   ;;  %v604_v17 = vld [vmem:[%s677_s26 + $0x30] ss:$8 sps:$4 sm:$0xff]  }
  0x25   : > { %v530_v18 = vld [vmem:[%s224_s8] ss:$0 sm:$0xff] }
  0x26   : > { %372 = vmatpush1.bf16.msra.mxu0 %v585_v4  ;;  %565 = vmatpush1.bf16.msra.mxu1 %v585_v4 }
  0x27   : > { %373 = vmatprep.subr.bf16.mxu0 %v628_v0  ;;  %557 = vmatprep.subr.bf16.mxu1 %v628_v0 }
  0x2a   : > { %374 = vmatpush1.bf16.msra.mxu0 %v586_v5  ;;  %566 = vmatpush1.bf16.msra.mxu1 %v586_v5 }
  0x2b   : > { %375 = vmatprep.subr.bf16.mxu0 %v628_v0  ;;  %558 = vmatprep.subr.bf16.mxu1 %v628_v0 }
  0x2e   : > { %376 = vmatpush1.bf16.msra.mxu0 %v587_v6  ;;  %567 = vmatpush1.bf16.msra.mxu1 %v587_v6 }
  0x2f   : > { %377 = vmatprep.subr.bf16.mxu0 %v628_v0  ;;  %559 = vmatprep.subr.bf16.mxu1 %v628_v0 }
  0x32   : > { %378 = vmatpush1.bf16.msra.mxu0 %v588_v7  ;;  %568 = vmatpush1.bf16.msra.mxu1 %v588_v7 }
  0x33   : > { %379 = vmatprep.subr.bf16.mxu0 %v628_v0  ;;  %560 = vmatprep.subr.bf16.mxu1 %v628_v0 }
  0x36   : > { %380 = vmatpush1.bf16.msra.mxu0 %v589_v8  ;;  %569 = vmatpush1.bf16.msra.mxu1 %v589_v8 }
  0x37   : > { %381 = vmatprep.subr.bf16.mxu0 %v628_v0  ;;  %561 = vmatprep.subr.bf16.mxu1 %v628_v0 }
  0x3a   : > { %382 = vmatpush1.bf16.msra.mxu0 %v590_v9  ;;  %570 = vmatpush1.bf16.msra.mxu1 %v590_v9 }
  0x3b   : > { %383 = vmatprep.subr.bf16.mxu0 %v628_v0  ;;  %562 = vmatprep.subr.bf16.mxu1 %v628_v0 }
  0x3e   : > { %384 = vmatpush1.bf16.msra.mxu0 %v591_v10  ;;  %571 = vmatpush1.bf16.msra.mxu1 %v591_v10 }
  0x3f   : > { %385 = vmatprep.subr.bf16.mxu0 %v628_v0  ;;  %563 = vmatprep.subr.bf16.mxu1 %v628_v0 }
  0x42   : > { %386 = vmatpush1.bf16.msra.mxu0 %v592_v11  ;;  %572 = vmatpush1.bf16.msra.mxu1 %v592_v11 }
  0x45   : > { %402 = vmatmul.mubr.bf16.vlgmr.msra.gmra.mrb[0].mxu0 %v593_v12  ;;  %418 = vmatmul.mubr.bf16.vlgmr.msra.gmra.mrb[0].mxu1 %v596_v13 }
  0x46   : > { %549 = vmatprep.mubr.msk.bf16.mxu0 %vm356_vm0, %v599_v14  ;;  %551 = vmatprep.mubr.msk.bf16.mxu1 %vm356_vm0, %v601_v15 }
  0x4d   : > { %410 = vmatmul.mubr.bf16.gmra.mrb[4].mxu0 %v603_v16  ;;  %426 = vmatmul.mubr.bf16.gmra.mrb[4].mxu1 %v604_v17 }
 0x118   : > { %v403_v19 = vpop.f32.mrb[0].mxu0  ;;  %v419_v20 = vpop.f32.mrb[0].mxu1 }
 0x119   : > { %v404_v21 = vadd.f32 %v530_v18, %v403_v19  ;;  %v420_v22 = vadd.f32 %v530_v18, %v419_v20  ;;  %v405_v23 = vpop.f32.mrb[1].mxu0  ;;  %v421_v24 = vpop.f32.mrb[1].mxu1 }
 0x11a   : > { %v406_v25 = vpop.f32.mrb[2].mxu0  ;;  %v422_v26 = vpop.f32.mrb[2].mxu1 }
 0x11b   : > { %434 = vst [vmem:[%s714_s11] sm:$0xff] %v404_v21  ;;  %438 = vst [vmem:[%s714_s11 + $0x20] sm:$0xff] %v420_v22  ;;  %v407_v27 = vadd.f32 %v530_v18, %v406_v25  ;;  %v423_v28 = vadd.f32 %v530_v18, %v422_v26  ;;  %v408_v29 = vpop.f32.mrb[3].mxu0  ;;  %v424_v30 = vpop.f32.mrb[3].mxu1 }
 0x11d   : > { %435 = vst [vmem:[%s714_s11 + $0x8] sm:$0xff] %v407_v27  ;;  %439 = vst [vmem:[%s714_s11 + $0x28] sm:$0xff] %v423_v28 }
 0x120   : > { %v411_v31 = vpop.f32.mrb[4].mxu0  ;;  %v427_v32 = vpop.f32.mrb[4].mxu1 }
 0x121   : > { %v412_v33 = vadd.f32 %v530_v18, %v411_v31  ;;  %v428_v34 = vadd.f32 %v530_v18, %v427_v32  ;;  %v413_v35 = vpop.f32.mrb[5].mxu0  ;;  %v429_v36 = vpop.f32.mrb[5].mxu1 }
 0x122   : > { %v414_v37 = vpop.f32.mrb[6].mxu0  ;;  %v430_v38 = vpop.f32.mrb[6].mxu1 }
 0x123   : > { %436 = vst [vmem:[%s714_s11 + $0x10] sm:$0xff] %v412_v33  ;;  %440 = vst [vmem:[%s714_s11 + $0x30] sm:$0xff] %v428_v34  ;;  %v415_v39 = vadd.f32 %v530_v18, %v414_v37  ;;  %v431_v40 = vadd.f32 %v530_v18, %v430_v38  ;;  %v416_v41 = vpop.f32.mrb[7].mxu0  ;;  %v432_v42 = vpop.f32.mrb[7].mxu1 }
 0x125   : > { %437 = vst [vmem:[%s714_s11 + $0x18] sm:$0xff] %v415_v39  ;;  %441 = vst [vmem:[%s714_s11 + $0x38] sm:$0xff] %v431_v40 }
 0x126 PF: > { %s20_s20 = sadd.s32 1, %s625_s20  }
 0x127   : > { %p17_p11 = scmp.ge.s32.totalorder %s20_s20, 5  }
 0x129   :  { %19 = sbr.rel (!%p17_p11) target bundleno = 16 (0x10), region = 68 }

</bundles_post_ra>
